<compile_context>
chip_gen: v7x
topology: tpu7x:2x2x1
jax: 0.10.0
libtpu: 0.0.40
codegen_flags: <defaults>
</compile_context>

<pallas_src>
import jax
import jax.numpy as jnp
from jax.experimental import pallas as pl
from jax.experimental.pallas import tpu as pltpu

_UNROLL = 8  # bounded unroll for the in-kernel time loop


def _round_up(x, m):
    return (x + m - 1) // m * m


def _pad_last(a, target):
    pad = target - a.shape[-1]
    if pad == 0:
        return a
    return jnp.pad(a, [(0, 0)] * (a.ndim - 1) + [(0, pad)])


# --------------------------------------------------------------------------
# Stage 1: batched input-only projection (hoisted out of the recurrence).
#   xc = tanh(x @ W_cp + b_cp) @ W_mc + b_m        x: (rows, I) -> xc: (rows, Rp)
# --------------------------------------------------------------------------
def input_projection_kernel(x_ref, w_cp_ref, b_cp_ref, w_mc_ref, b_m_ref, xc_ref):
    cd = w_cp_ref.dtype  # matmul compute dtype (bf16); accumulation is f32
    cp = jnp.tanh(
        jnp.dot(x_ref[...].astype(cd), w_cp_ref[...],
                preferred_element_type=jnp.float32)
        + b_cp_ref[...]
    )
    xc_ref[...] = (
        jnp.dot(cp.astype(cd), w_mc_ref[...],
                preferred_element_type=jnp.float32)
        + b_m_ref[...]
    ).astype(xc_ref.dtype)


# --------------------------------------------------------------------------
# Stage 2: the serialized recurrence.  One grid step handles one (batch chunk,
# time chunk); h is carried through a bounded-unroll fori_loop in vregs and
# across time chunks via a VMEM scratch.
# --------------------------------------------------------------------------
def rcell_recurrence_kernel(xc_ref, w_ref, b_ref, hseq_ref, h_ref):
    # xc_ref  : (Tc, Nb, Rp) bf16/f32 — precomputed input path (+ b_m), lane-padded
    # w_ref   : (4, Rp, Rp)           — [w_hiddenPrep, w_meshup_hidden, w_post1, w_post2]
    # b_ref   : (3, 1, Rp) f32        — [b_hiddenPrep, b_post1, b_post2]
    # hseq_ref: (Tc, Nb, Rp)          — output hidden-state sequence block
    # h_ref   : (Nb, Rp) f32 scratch  — hidden carried across time chunks
    Tc, Nb, Rp = xc_ref.shape

    @pl.when(pl.program_id(1) == 0)     # first time chunk of this batch chunk
    def _init():
        h_ref[...] = jnp.zeros_like(h_ref)

    # Hoist all weight/bias loads (and bias broadcasts) above the time loop.
    w_hp = w_ref[0]
    w_mh = w_ref[1]
    w_p1 = w_ref[2]
    w_p2 = w_ref[3]
    cd = w_hp.dtype                     # bf16 MXU operands; accumulation f32
    b_hp = jnp.broadcast_to(b_ref[0], (Nb, Rp))
    b_p1 = jnp.broadcast_to(b_ref[1], (Nb, Rp))
    b_p2 = jnp.broadcast_to(b_ref[2], (Nb, Rp))

    def step(t, h):
        hp = jnp.tanh(
            jnp.dot(h.astype(cd), w_hp, preferred_element_type=jnp.float32) + b_hp)
        m = jnp.tanh(
            jnp.dot(hp.astype(cd), w_mh, preferred_element_type=jnp.float32)
            + xc_ref[t].astype(jnp.float32))
        p1 = jnp.tanh(
            jnp.dot(m.astype(cd), w_p1, preferred_element_type=jnp.float32) + b_p1)
        p2 = jnp.tanh(
            jnp.dot(p1.astype(cd), w_p2, preferred_element_type=jnp.float32) + b_p2)
        h_new = h + p2                               # residual hidden update (f32)
        hseq_ref[t] = h_new.astype(hseq_ref.dtype)   # lane-dense unmasked store
        return h_new

    h_final = jax.lax.fori_loop(0, Tc, step, h_ref[...], unroll=min(_UNROLL, Tc))
    h_ref[...] = h_final                             # carry to next time chunk


# --------------------------------------------------------------------------
# Wrapper
# --------------------------------------------------------------------------
def rcell_complex_forward(inputs, params, *, compute_dtype=jnp.bfloat16,
                          row_block=1024, batch_block=None, time_block=None):
    """inputs: (T, N, input_size) -> hidden sequence (T, N, recurrent_size).

    compute_dtype: MXU operand dtype (bf16 default on all generations; f32
      accumulation is kept everywhere).
    batch_block: batch rows per grid step.  Default N (single TensorCore on
      v5e/v6e).  On v7x with large N, pass N//2 so the "parallel" axis can be
      spread across both TensorCores; keep batch_block*Rp*4 B <= ~64 KiB so
      the fori_loop hidden carry does not spill the vreg file.
    time_block: timesteps per grid step (caps resident VMEM independent of T).
    """
    T, N, I = inputs.shape
    R = params["w_hp"].shape[0]
    S = params["w_cp"].shape[1]
    Rp = _round_up(R, 128)              # lane-dense padded recurrent width

    # ---- Stage 1: hoisted, batched over all T*N rows (row-tiled grid).
    rows = T * N
    rb = min(row_block, _round_up(rows, 8))
    rows_p = _round_up(rows, rb)
    x2 = inputs.reshape(rows, I).astype(jnp.float32)
    if rows_p != rows:
        x2 = jnp.pad(x2, ((0, rows_p - rows), (0, 0)))

    w_cp = params["w_cp"].astype(compute_dtype)                   # (I, S)
    b_cp = params["b_cp"].astype(jnp.float32)                     # (1, S)
    w_mc = _pad_last(params["w_mc"], Rp).astype(compute_dtype)    # (S, Rp)
    b_m = _pad_last(params["b_m"], Rp).astype(jnp.float32)        # (1, Rp)

    xc2 = pl.pallas_call(
        input_projection_kernel,
        out_shape=jax.ShapeDtypeStruct((rows_p, Rp), compute_dtype),
        grid_spec=pltpu.PrefetchScalarGridSpec(
            num_scalar_prefetch=0,
            grid=(rows_p // rb,),
            in_specs=[
                pl.BlockSpec((rb, I), lambda r: (r, 0)),
                pl.BlockSpec((I, S), lambda r: (0, 0)),
                pl.BlockSpec((1, S), lambda r: (0, 0)),
                pl.BlockSpec((S, Rp), lambda r: (0, 0)),
                pl.BlockSpec((1, Rp), lambda r: (0, 0)),
            ],
            out_specs=pl.BlockSpec((rb, Rp), lambda r: (r, 0)),
        ),
        compiler_params=pltpu.CompilerParams(
            dimension_semantics=("parallel",)),
    )(x2, w_cp, b_cp, w_mc, b_m)
    xc = xc2[:rows].reshape(T, N, Rp)

    # ---- Stage 2: recurrence.  Stack + lane-pad the four RxR weights and the
    # three biases; padding is exact (zero columns stay zero through tanh).
    def pad_sq(w):
        return jnp.pad(w, ((0, Rp - R), (0, Rp - R)))

    w_stack = jnp.stack(
        [pad_sq(params["w_hp"]), pad_sq(params["w_mh"]),
         pad_sq(params["w_p1"]), pad_sq(params["w_p2"])]
    ).astype(compute_dtype)                                       # (4, Rp, Rp)
    b_stack = jnp.stack(
        [_pad_last(params["b_hp"], Rp), _pad_last(params["b_p1"], Rp),
         _pad_last(params["b_p2"], Rp)]
    ).astype(jnp.float32)                                         # (3, 1, Rp)

    if batch_block is None:
        batch_block = N                 # v5e/v6e: single TC, no batch split
    assert N % batch_block == 0 and (batch_block == N or batch_block % 8 == 0), (
        "batch_block must divide N and be a multiple of 8 (sublane dim)")
    if time_block is None:
        time_block = T if T <= 32 else next(
            tb for tb in (32, 16, 8, 4, 2, 1) if T % tb == 0)
    assert T % time_block == 0, "time_block must divide T"

    grid = (N // batch_block, T // time_block)

    hseq_p = pl.pallas_call(
        rcell_recurrence_kernel,
        out_shape=jax.ShapeDtypeStruct((T, N, Rp), inputs.dtype),
        grid_spec=pltpu.PrefetchScalarGridSpec(
            num_scalar_prefetch=0,
            grid=grid,
            in_specs=[
                pl.BlockSpec((time_block, batch_block, Rp),
                             lambda b, t: (t, b, 0)),             # xc
                # Grid-invariant weights/biases.  (At production R, consider
                # pipeline_mode=pl.Buffered(1) or a one-time copy into scratch
                # so they are not double-buffered.)
                pl.BlockSpec((4, Rp, Rp), lambda b, t: (0, 0, 0)),
                pl.BlockSpec((3, 1, Rp), lambda b, t: (0, 0, 0)),
            ],
            out_specs=pl.BlockSpec((time_block, batch_block, Rp),
                                   lambda b, t: (t, b, 0)),
            scratch_shapes=[pltpu.VMEM((batch_block, Rp), jnp.float32)],
        ),
        compiler_params=pltpu.CompilerParams(
            # Batch chunks are independent -> parallel (exploitable by v7x's
            # 2 TCs); the time axis carries the hidden state -> arbitrary.
            dimension_semantics=("parallel", "arbitrary")),
    )(xc, w_stack, b_stack)

    return hseq_p[..., :R]


# --------------------------------------------------------------------------
# Params (mimic nn.Linear init, stored transposed so kernels do x @ W + b).
# meshup's weight is split into its hidden part (w_mh) and input part (w_mc),
# which is mathematically identical to the torch concat formulation.
# --------------------------------------------------------------------------
def init_params(key, input_size, inter_size, recurrent_size):
    def linear(k, fan_in, fan_out):
        kw, kb = jax.random.split(k)
        bound = 1.0 / jnp.sqrt(jnp.float32(fan_in))
        w = jax.random.uniform(kw, (fan_out, fan_in), jnp.float32, -bound, bound)
        b = jax.random.uniform(kb, (fan_out,), jnp.float32, -bound, bound)
        return w, b

    keys = jax.random.split(key, 5)
    w_hp, b_hp = linear(keys[0], recurrent_size, recurrent_size)
    w_cp, b_cp = linear(keys[1], input_size, inter_size)
    w_m, b_m = linear(keys[2], recurrent_size + inter_size, recurrent_size)
    w_p1, b_p1 = linear(keys[3], recurrent_size, recurrent_size)
    w_p2, b_p2 = linear(keys[4], recurrent_size, recurrent_size)

    return {
        "w_hp": w_hp.T, "b_hp": b_hp[None, :],
        "w_cp": w_cp.T, "b_cp": b_cp[None, :],
        "w_mh": w_m[:, :recurrent_size].T,   # (R, R) — hidden half of meshup
        "w_mc": w_m[:, recurrent_size:].T,   # (S, R) — input half of meshup
        "b_m": b_m[None, :],
        "w_p1": w_p1.T, "b_p1": b_p1[None, :],
        "w_p2": w_p2.T, "b_p2": b_p2[None, :],
    }


# --------------------------------------------------------------------------
# Pure-JAX references.
# --------------------------------------------------------------------------
_PREC = jax.lax.Precision.HIGHEST  # reference only (exact-f32 module semantics)


def reference_forward(inputs, params):
    """Exact-f32 reference matching the PyTorch module semantics."""
    def step(h, x):
        hp = jnp.tanh(jnp.dot(h, params["w_hp"], precision=_PREC) + params["b_hp"])
        cp = jnp.tanh(jnp.dot(x, params["w_cp"], precision=_PREC) + params["b_cp"])
        m = jnp.tanh(jnp.dot(hp, params["w_mh"], precision=_PREC)
                     + jnp.dot(cp, params["w_mc"], precision=_PREC)
                     + params["b_m"])
        p1 = jnp.tanh(jnp.dot(m, params["w_p1"], precision=_PREC) + params["b_p1"])
        p2 = jnp.tanh(jnp.dot(p1, params["w_p2"], precision=_PREC) + params["b_p2"])
        h_new = h + p2
        return h_new, h_new

    N = inputs.shape[1]
    R = params["w_hp"].shape[0]
    h0 = jnp.zeros((N, R), jnp.float32)
    _, hidden_seq = jax.lax.scan(step, h0, inputs)
    return hidden_seq


def matched_reference_forward(inputs, params, compute_dtype=jnp.bfloat16):
    """Reference mirroring the kernel's bf16-operand / f32-accumulate math."""
    def dot(a, b):
        return jnp.dot(a.astype(compute_dtype), b.astype(compute_dtype),
                       preferred_element_type=jnp.float32)

    T, N, I = inputs.shape
    R = params["w_hp"].shape[0]
    x2 = inputs.reshape(T * N, I).astype(jnp.float32)
    cp = jnp.tanh(dot(x2, params["w_cp"]) + params["b_cp"])
    xc = (dot(cp, params["w_mc"]) + params["b_m"]).astype(compute_dtype)
    xc = xc.astype(jnp.float32).reshape(T, N, R)

    def step(h, xc_t):
        hp = jnp.tanh(dot(h, params["w_hp"]) + params["b_hp"])
        m = jnp.tanh(dot(hp, params["w_mh"]) + xc_t)
        p1 = jnp.tanh(dot(m, params["w_p1"]) + params["b_p1"])
        p2 = jnp.tanh(dot(p1, params["w_p2"]) + params["b_p2"])
        h_new = h + p2
        return h_new, h_new

    h0 = jnp.zeros((N, R), jnp.float32)
    _, hidden_seq = jax.lax.scan(step, h0, xc)
    return hidden_seq


if __name__ == "__main__":
    # Small shapes consistent with the module:
    # RCell_complex(input_size=4, inter_size=16, recurrent_size=32)
    T, N = 8, 8
    input_size, inter_size, recurrent_size = 4, 16, 32

    key = jax.random.PRNGKey(0)
    k_in, k_par = jax.random.split(key)

    inputs = jax.random.normal(k_in, (T, N, input_size), jnp.float32)
    params = init_params(k_par, input_size, inter_size, recurrent_size)

    hidden_seq = jax.jit(rcell_complex_forward)(inputs, params)
    hidden_seq = jax.block_until_ready(hidden_seq)
    assert hidden_seq.shape == (T, N, recurrent_size)

    # Tight check vs a reference using the kernel's exact bf16-operand math.
    matched = jax.block_until_ready(matched_reference_forward(inputs, params))
    assert jnp.allclose(hidden_seq, matched, atol=5e-3, rtol=5e-3), \
        "mismatch vs bf16-matched JAX reference"

    # Sanity check vs exact-f32 module semantics (loose: bf16 MXU operands).
    ref = jax.block_until_ready(reference_forward(inputs, params))
    assert jnp.allclose(hidden_seq, ref, atol=1e-1, rtol=1e-1), \
        "mismatch vs f32 JAX reference"

    print("KERNEL_OK")
</pallas_src>

<mosaic_0001>
module attributes {stable_mosaic.version = 11 : i64} {
  func.func @input_projection_kernel(%arg0: i32, %arg1: memref<64x4xf32, #tpu.memory_space<vmem>>, %arg2: memref<4x16xbf16, #tpu.memory_space<vmem>>, %arg3: memref<1x16xf32, #tpu.memory_space<vmem>>, %arg4: memref<16x128xbf16, #tpu.memory_space<vmem>>, %arg5: memref<1x128xf32, #tpu.memory_space<vmem>>, %arg6: memref<64x128xbf16, #tpu.memory_space<vmem>>) attributes {dimension_semantics = [#tpu.dimension_semantics<parallel>], iteration_bounds = array<i64: 1>, scalar_prefetch = 0 : i64, scratch_operands = 0 : i64, tpu.core_type = #tpu.core_type<tc>, window_params = [{transform_indices = @transform_0, window_bounds = array<i64: 64, 4>}, {pipeline_mode = #tpu.pipeline_mode<synchronous>, transform_indices = @transform_1, window_bounds = array<i64: 4, 16>}, {pipeline_mode = #tpu.pipeline_mode<synchronous>, transform_indices = @transform_2, window_bounds = array<i64: 1, 16>}, {pipeline_mode = #tpu.pipeline_mode<synchronous>, transform_indices = @transform_3, window_bounds = array<i64: 16, 128>}, {pipeline_mode = #tpu.pipeline_mode<synchronous>, transform_indices = @transform_4, window_bounds = array<i64: 1, 128>}, {transform_indices = @transform_5, window_bounds = array<i64: 64, 128>}]} {
    %c0 = arith.constant 0 : index
    %c0_0 = arith.constant 0 : index
    %0 = vector.load %arg1[%c0, %c0_0] : memref<64x4xf32, #tpu.memory_space<vmem>>, vector<64x4xf32>
    %1 = arith.truncf %0 : vector<64x4xf32> to vector<64x4xbf16>
    %c0_1 = arith.constant 0 : index
    %c0_2 = arith.constant 0 : index
    %2 = vector.load %arg2[%c0_1, %c0_2] : memref<4x16xbf16, #tpu.memory_space<vmem>>, vector<4x16xbf16>
    %cst = arith.constant dense<0.000000e+00> : vector<64x16xf32>
    %3 = tpu.matmul %1, %2, %cst {dimension_numbers = #tpu.dot_dimension_numbers<[1], [0], [0], [1], [0, 0, 1, 1], [], []>} : vector<64x4xbf16>, vector<4x16xbf16>, vector<64x16xf32> -> vector<64x16xf32>
    %c0_3 = arith.constant 0 : index
    %c0_4 = arith.constant 0 : index
    %4 = vector.load %arg3[%c0_3, %c0_4] : memref<1x16xf32, #tpu.memory_space<vmem>>, vector<1x16xf32>
    %5 = vector.broadcast %4 : vector<1x16xf32> to vector<64x16xf32>
    %6 = arith.addf %3, %5 : vector<64x16xf32>
    %7 = math.tanh %6 : vector<64x16xf32>
    %8 = arith.truncf %7 : vector<64x16xf32> to vector<64x16xbf16>
    %c0_5 = arith.constant 0 : index
    %c0_6 = arith.constant 0 : index
    %9 = vector.load %arg4[%c0_5, %c0_6] : memref<16x128xbf16, #tpu.memory_space<vmem>>, vector<16x128xbf16>
    %cst_7 = arith.constant dense<0.000000e+00> : vector<64x128xf32>
    %10 = tpu.matmul %8, %9, %cst_7 {dimension_numbers = #tpu.dot_dimension_numbers<[1], [0], [0], [1], [0, 0, 1, 1], [], []>} : vector<64x16xbf16>, vector<16x128xbf16>, vector<64x128xf32> -> vector<64x128xf32>
    %c0_8 = arith.constant 0 : index
    %c0_9 = arith.constant 0 : index
    %11 = vector.load %arg5[%c0_8, %c0_9] : memref<1x128xf32, #tpu.memory_space<vmem>>, vector<1x128xf32>
    %12 = vector.broadcast %11 : vector<1x128xf32> to vector<64x128xf32>
    %13 = arith.addf %10, %12 : vector<64x128xf32>
    %14 = arith.truncf %13 : vector<64x128xf32> to vector<64x128xbf16>
    %c0_10 = arith.constant 0 : index
    %c0_11 = arith.constant 0 : index
    %15 = vector.load %arg6[%c0_10, %c0_11] : memref<64x128xbf16, #tpu.memory_space<vmem>>, vector<64x128xbf16>
    tpu.vector_store %arg6[%c0_10, %c0_11], %14 {strides = array<i32>} : memref<64x128xbf16, #tpu.memory_space<vmem>>, vector<64x128xbf16>,
    return
  }
  func.func @transform_0(%arg0: i32) -> (i32, i32) {
    %c0_i32 = arith.constant 0 : i32
    %c0_i32_0 = arith.constant 0 : i32
    return %arg0, %c0_i32 : i32, i32
  }
  func.func @transform_1(%arg0: i32) -> (i32, i32) {
    %c0_i32 = arith.constant 0 : i32
    %c0_i32_0 = arith.constant 0 : i32
    %c0_i32_1 = arith.constant 0 : i32
    return %c0_i32, %c0_i32_0 : i32, i32
  }
  func.func @transform_2(%arg0: i32) -> (i32, i32) {
    %c0_i32 = arith.constant 0 : i32
    %c0_i32_0 = arith.constant 0 : i32
    %c0_i32_1 = arith.constant 0 : i32
    return %c0_i32, %c0_i32_0 : i32, i32
  }
  func.func @transform_3(%arg0: i32) -> (i32, i32) {
    %c0_i32 = arith.constant 0 : i32
    %c0_i32_0 = arith.constant 0 : i32
    %c0_i32_1 = arith.constant 0 : i32
    return %c0_i32, %c0_i32_0 : i32, i32
  }
  func.func @transform_4(%arg0: i32) -> (i32, i32) {
    %c0_i32 = arith.constant 0 : i32
    %c0_i32_0 = arith.constant 0 : i32
    %c0_i32_1 = arith.constant 0 : i32
    return %c0_i32, %c0_i32_0 : i32, i32
  }
  func.func @transform_5(%arg0: i32) -> (i32, i32) {
    %c0_i32 = arith.constant 0 : i32
    %c0_i32_0 = arith.constant 0 : i32
    return %arg0, %c0_i32 : i32, i32
  }
}

module attributes {stable_mosaic.version = 11 : i64} {
  func.func @rcell_recurrence_kernel(%arg0: i32, %arg1: i32, %arg2: memref<8x8x128xbf16, #tpu.memory_space<vmem>>, %arg3: memref<4x128x128xbf16, #tpu.memory_space<vmem>>, %arg4: memref<3x1x128xf32, #tpu.memory_space<vmem>>, %arg5: memref<8x8x128xf32, #tpu.memory_space<vmem>>, %arg6: memref<8x128xf32, #tpu.memory_space<vmem>>) attributes {dimension_semantics = [#tpu.dimension_semantics<parallel>, #tpu.dimension_semantics<arbitrary>], iteration_bounds = array<i64: 1, 1>, scalar_prefetch = 0 : i64, scratch_operands = 1 : i64, tpu.core_type = #tpu.core_type<tc>, window_params = [{transform_indices = @transform_0, window_bounds = array<i64: 8, 8, 128>}, {pipeline_mode = #tpu.pipeline_mode<synchronous>, transform_indices = @transform_1, window_bounds = array<i64: 4, 128, 128>}, {pipeline_mode = #tpu.pipeline_mode<synchronous>, transform_indices = @transform_2, window_bounds = array<i64: 3, 1, 128>}, {transform_indices = @transform_3, window_bounds = array<i64: 8, 8, 128>}]} {
    %c0_i32 = arith.constant 0 : i32
    %0 = arith.cmpi eq, %arg1, %c0_i32 : i32
    %1 = arith.extui %0 : i1 to i32
    %c0_i32_0 = arith.constant 0 : i32
    %2 = arith.cmpi ne, %1, %c0_i32_0 : i32
    scf.if %2 {
      %cst_86 = arith.constant 0.000000e+00 : f32
      %225 = vector.broadcast %cst_86 : f32 to vector<8x128xf32>
      %c0_87 = arith.constant 0 : index
      %c0_88 = arith.constant 0 : index
      %226 = vector.load %arg6[%c0_87, %c0_88] : memref<8x128xf32, #tpu.memory_space<vmem>>, vector<8x128xf32>
      tpu.vector_store %arg6[%c0_87, %c0_88], %225 {strides = array<i32>} : memref<8x128xf32, #tpu.memory_space<vmem>>, vector<8x128xf32>,
    } else {
    }
    %c0 = arith.constant 0 : index
    %c0_1 = arith.constant 0 : index
    %c0_2 = arith.constant 0 : index
    %3 = vector.load %arg3[%c0, %c0_1, %c0_2] : memref<4x128x128xbf16, #tpu.memory_space<vmem>>, vector<1x128x128xbf16>
    %4 = vector.shape_cast %3 : vector<1x128x128xbf16> to vector<128x128xbf16>
    %c1 = arith.constant 1 : index
    %c0_3 = arith.constant 0 : index
    %c0_4 = arith.constant 0 : index
    %5 = vector.load %arg3[%c1, %c0_3, %c0_4] : memref<4x128x128xbf16, #tpu.memory_space<vmem>>, vector<1x128x128xbf16>
    %6 = vector.shape_cast %5 : vector<1x128x128xbf16> to vector<128x128xbf16>
    %c2 = arith.constant 2 : index
    %c0_5 = arith.constant 0 : index
    %c0_6 = arith.constant 0 : index
    %7 = vector.load %arg3[%c2, %c0_5, %c0_6] : memref<4x128x128xbf16, #tpu.memory_space<vmem>>, vector<1x128x128xbf16>
    %8 = vector.shape_cast %7 : vector<1x128x128xbf16> to vector<128x128xbf16>
    %c3 = arith.constant 3 : index
    %c0_7 = arith.constant 0 : index
    %c0_8 = arith.constant 0 : index
    %9 = vector.load %arg3[%c3, %c0_7, %c0_8] : memref<4x128x128xbf16, #tpu.memory_space<vmem>>, vector<1x128x128xbf16>
    %10 = vector.shape_cast %9 : vector<1x128x128xbf16> to vector<128x128xbf16>
    %c0_9 = arith.constant 0 : index
    %c0_10 = arith.constant 0 : index
    %c0_11 = arith.constant 0 : index
    %11 = vector.load %arg4[%c0_9, %c0_10, %c0_11] : memref<3x1x128xf32, #tpu.memory_space<vmem>>, vector<1x1x128xf32>
    %12 = vector.shape_cast %11 : vector<1x1x128xf32> to vector<1x128xf32>
    %13 = vector.shape_cast %12 : vector<1x128xf32> to vector<1x128xf32>
    %14 = vector.broadcast %13 : vector<1x128xf32> to vector<8x128xf32>
    %c1_12 = arith.constant 1 : index
    %c0_13 = arith.constant 0 : index
    %c0_14 = arith.constant 0 : index
    %15 = vector.load %arg4[%c1_12, %c0_13, %c0_14] : memref<3x1x128xf32, #tpu.memory_space<vmem>>, vector<1x1x128xf32>
    %16 = vector.shape_cast %15 : vector<1x1x128xf32> to vector<1x128xf32>
    %17 = vector.shape_cast %16 : vector<1x128xf32> to vector<1x128xf32>
    %18 = vector.broadcast %17 : vector<1x128xf32> to vector<8x128xf32>
    %c2_15 = arith.constant 2 : index
    %c0_16 = arith.constant 0 : index
    %c0_17 = arith.constant 0 : index
    %19 = vector.load %arg4[%c2_15, %c0_16, %c0_17] : memref<3x1x128xf32, #tpu.memory_space<vmem>>, vector<1x1x128xf32>
    %20 = vector.shape_cast %19 : vector<1x1x128xf32> to vector<1x128xf32>
    %21 = vector.shape_cast %20 : vector<1x128xf32> to vector<1x128xf32>
    %22 = vector.broadcast %21 : vector<1x128xf32> to vector<8x128xf32>
    %c0_18 = arith.constant 0 : index
    %c0_19 = arith.constant 0 : index
    %23 = vector.load %arg6[%c0_18, %c0_19] : memref<8x128xf32, #tpu.memory_space<vmem>>, vector<8x128xf32>
    %c0_i32_20 = arith.constant 0 : i32
    %24 = arith.truncf %23 : vector<8x128xf32> to vector<8x128xbf16>
    %cst = arith.constant dense<0.000000e+00> : vector<8x128xf32>
    %25 = tpu.matmul %24, %4, %cst {dimension_numbers = #tpu.dot_dimension_numbers<[1], [0], [0], [1], [0, 0, 1, 1], [], []>} : vector<8x128xbf16>, vector<128x128xbf16>, vector<8x128xf32> -> vector<8x128xf32>
    %26 = arith.addf %25, %14 : vector<8x128xf32>
    %27 = math.tanh %26 : vector<8x128xf32>
    %28 = arith.truncf %27 : vector<8x128xf32> to vector<8x128xbf16>
    %cst_21 = arith.constant dense<0.000000e+00> : vector<8x128xf32>
    %29 = tpu.matmul %28, %6, %cst_21 {dimension_numbers = #tpu.dot_dimension_numbers<[1], [0], [0], [1], [0, 0, 1, 1], [], []>} : vector<8x128xbf16>, vector<128x128xbf16>, vector<8x128xf32> -> vector<8x128xf32>
    %30 = arith.index_cast %c0_i32_20 : i32 to index
    %c0_22 = arith.constant 0 : index
    %c0_23 = arith.constant 0 : index
    %31 = vector.load %arg2[%30, %c0_22, %c0_23] : memref<8x8x128xbf16, #tpu.memory_space<vmem>>, vector<1x8x128xbf16>
    %32 = vector.shape_cast %31 : vector<1x8x128xbf16> to vector<8x128xbf16>
    %33 = arith.extf %32 : vector<8x128xbf16> to vector<8x128xf32>
    %34 = arith.addf %29, %33 : vector<8x128xf32>
    %35 = math.tanh %34 : vector<8x128xf32>
    %36 = arith.truncf %35 : vector<8x128xf32> to vector<8x128xbf16>
    %cst_24 = arith.constant dense<0.000000e+00> : vector<8x128xf32>
    %37 = tpu.matmul %36, %8, %cst_24 {dimension_numbers = #tpu.dot_dimension_numbers<[1], [0], [0], [1], [0, 0, 1, 1], [], []>} : vector<8x128xbf16>, vector<128x128xbf16>, vector<8x128xf32> -> vector<8x128xf32>
    %38 = arith.addf %37, %18 : vector<8x128xf32>
    %39 = math.tanh %38 : vector<8x128xf32>
    %40 = arith.truncf %39 : vector<8x128xf32> to vector<8x128xbf16>
    %cst_25 = arith.constant dense<0.000000e+00> : vector<8x128xf32>
    %41 = tpu.matmul %40, %10, %cst_25 {dimension_numbers = #tpu.dot_dimension_numbers<[1], [0], [0], [1], [0, 0, 1, 1], [], []>} : vector<8x128xbf16>, vector<128x128xbf16>, vector<8x128xf32> -> vector<8x128xf32>
    %42 = arith.addf %41, %22 : vector<8x128xf32>
    %43 = math.tanh %42 : vector<8x128xf32>
    %44 = arith.addf %23, %43 : vector<8x128xf32>
    %45 = arith.index_cast %c0_i32_20 : i32 to index
    %c0_26 = arith.constant 0 : index
    %c0_27 = arith.constant 0 : index
    %46 = vector.load %arg5[%45, %c0_26, %c0_27] : memref<8x8x128xf32, #tpu.memory_space<vmem>>, vector<1x8x128xf32>
    %47 = vector.shape_cast %46 : vector<1x8x128xf32> to vector<8x128xf32>
    %48 = vector.shape_cast %44 : vector<8x128xf32> to vector<1x8x128xf32>
    tpu.vector_store %arg5[%45, %c0_26, %c0_27], %48 {strides = array<i32>} : memref<8x8x128xf32, #tpu.memory_space<vmem>>, vector<1x8x128xf32>,
    %c1_i32 = arith.constant 1 : i32
    %49 = arith.truncf %44 : vector<8x128xf32> to vector<8x128xbf16>
    %cst_28 = arith.constant dense<0.000000e+00> : vector<8x128xf32>
    %50 = tpu.matmul %49, %4, %cst_28 {dimension_numbers = #tpu.dot_dimension_numbers<[1], [0], [0], [1], [0, 0, 1, 1], [], []>} : vector<8x128xbf16>, vector<128x128xbf16>, vector<8x128xf32> -> vector<8x128xf32>
    %51 = arith.addf %50, %14 : vector<8x128xf32>
    %52 = math.tanh %51 : vector<8x128xf32>
    %53 = arith.truncf %52 : vector<8x128xf32> to vector<8x128xbf16>
    %cst_29 = arith.constant dense<0.000000e+00> : vector<8x128xf32>
    %54 = tpu.matmul %53, %6, %cst_29 {dimension_numbers = #tpu.dot_dimension_numbers<[1], [0], [0], [1], [0, 0, 1, 1], [], []>} : vector<8x128xbf16>, vector<128x128xbf16>, vector<8x128xf32> -> vector<8x128xf32>
    %55 = arith.index_cast %c1_i32 : i32 to index
    %c0_30 = arith.constant 0 : index
    %c0_31 = arith.constant 0 : index
    %56 = vector.load %arg2[%55, %c0_30, %c0_31] : memref<8x8x128xbf16, #tpu.memory_space<vmem>>, vector<1x8x128xbf16>
    %57 = vector.shape_cast %56 : vector<1x8x128xbf16> to vector<8x128xbf16>
    %58 = arith.extf %57 : vector<8x128xbf16> to vector<8x128xf32>
    %59 = arith.addf %54, %58 : vector<8x128xf32>
    %60 = math.tanh %59 : vector<8x128xf32>
    %61 = arith.truncf %60 : vector<8x128xf32> to vector<8x128xbf16>
    %cst_32 = arith.constant dense<0.000000e+00> : vector<8x128xf32>
    %62 = tpu.matmul %61, %8, %cst_32 {dimension_numbers = #tpu.dot_dimension_numbers<[1], [0], [0], [1], [0, 0, 1, 1], [], []>} : vector<8x128xbf16>, vector<128x128xbf16>, vector<8x128xf32> -> vector<8x128xf32>
    %63 = arith.addf %62, %18 : vector<8x128xf32>
    %64 = math.tanh %63 : vector<8x128xf32>
    %65 = arith.truncf %64 : vector<8x128xf32> to vector<8x128xbf16>
    %cst_33 = arith.constant dense<0.000000e+00> : vector<8x128xf32>
    %66 = tpu.matmul %65, %10, %cst_33 {dimension_numbers = #tpu.dot_dimension_numbers<[1], [0], [0], [1], [0, 0, 1, 1], [], []>} : vector<8x128xbf16>, vector<128x128xbf16>, vector<8x128xf32> -> vector<8x128xf32>
    %67 = arith.addf %66, %22 : vector<8x128xf32>
    %68 = math.tanh %67 : vector<8x128xf32>
    %69 = arith.addf %44, %68 : vector<8x128xf32>
    %70 = arith.index_cast %c1_i32 : i32 to index
    %c0_34 = arith.constant 0 : index
    %c0_35 = arith.constant 0 : index
    %71 = vector.load %arg5[%70, %c0_34, %c0_35] : memref<8x8x128xf32, #tpu.memory_space<vmem>>, vector<1x8x128xf32>
    %72 = vector.shape_cast %71 : vector<1x8x128xf32> to vector<8x128xf32>
    %73 = vector.shape_cast %69 : vector<8x128xf32> to vector<1x8x128xf32>
    tpu.vector_store %arg5[%70, %c0_34, %c0_35], %73 {strides = array<i32>} : memref<8x8x128xf32, #tpu.memory_space<vmem>>, vector<1x8x128xf32>,
    %c2_i32 = arith.constant 2 : i32
    %74 = arith.truncf %69 : vector<8x128xf32> to vector<8x128xbf16>
    %cst_36 = arith.constant dense<0.000000e+00> : vector<8x128xf32>
    %75 = tpu.matmul %74, %4, %cst_36 {dimension_numbers = #tpu.dot_dimension_numbers<[1], [0], [0], [1], [0, 0, 1, 1], [], []>} : vector<8x128xbf16>, vector<128x128xbf16>, vector<8x128xf32> -> vector<8x128xf32>
    %76 = arith.addf %75, %14 : vector<8x128xf32>
    %77 = math.tanh %76 : vector<8x128xf32>
    %78 = arith.truncf %77 : vector<8x128xf32> to vector<8x128xbf16>
    %cst_37 = arith.constant dense<0.000000e+00> : vector<8x128xf32>
    %79 = tpu.matmul %78, %6, %cst_37 {dimension_numbers = #tpu.dot_dimension_numbers<[1], [0], [0], [1], [0, 0, 1, 1], [], []>} : vector<8x128xbf16>, vector<128x128xbf16>, vector<8x128xf32> -> vector<8x128xf32>
    %80 = arith.index_cast %c2_i32 : i32 to index
    %c0_38 = arith.constant 0 : index
    %c0_39 = arith.constant 0 : index
    %81 = vector.load %arg2[%80, %c0_38, %c0_39] : memref<8x8x128xbf16, #tpu.memory_space<vmem>>, vector<1x8x128xbf16>
    %82 = vector.shape_cast %81 : vector<1x8x128xbf16> to vector<8x128xbf16>
    %83 = arith.extf %82 : vector<8x128xbf16> to vector<8x128xf32>
    %84 = arith.addf %79, %83 : vector<8x128xf32>
    %85 = math.tanh %84 : vector<8x128xf32>
    %86 = arith.truncf %85 : vector<8x128xf32> to vector<8x128xbf16>
    %cst_40 = arith.constant dense<0.000000e+00> : vector<8x128xf32>
    %87 = tpu.matmul %86, %8, %cst_40 {dimension_numbers = #tpu.dot_dimension_numbers<[1], [0], [0], [1], [0, 0, 1, 1], [], []>} : vector<8x128xbf16>, vector<128x128xbf16>, vector<8x128xf32> -> vector<8x128xf32>
    %88 = arith.addf %87, %18 : vector<8x128xf32>
    %89 = math.tanh %88 : vector<8x128xf32>
    %90 = arith.truncf %89 : vector<8x128xf32> to vector<8x128xbf16>
    %cst_41 = arith.constant dense<0.000000e+00> : vector<8x128xf32>
    %91 = tpu.matmul %90, %10, %cst_41 {dimension_numbers = #tpu.dot_dimension_numbers<[1], [0], [0], [1], [0, 0, 1, 1], [], []>} : vector<8x128xbf16>, vector<128x128xbf16>, vector<8x128xf32> -> vector<8x128xf32>
    %92 = arith.addf %91, %22 : vector<8x128xf32>
    %93 = math.tanh %92 : vector<8x128xf32>
    %94 = arith.addf %69, %93 : vector<8x128xf32>
    %95 = arith.index_cast %c2_i32 : i32 to index
    %c0_42 = arith.constant 0 : index
    %c0_43 = arith.constant 0 : index
    %96 = vector.load %arg5[%95, %c0_42, %c0_43] : memref<8x8x128xf32, #tpu.memory_space<vmem>>, vector<1x8x128xf32>
    %97 = vector.shape_cast %96 : vector<1x8x128xf32> to vector<8x128xf32>
    %98 = vector.shape_cast %94 : vector<8x128xf32> to vector<1x8x128xf32>
    tpu.vector_store %arg5[%95, %c0_42, %c0_43], %98 {strides = array<i32>} : memref<8x8x128xf32, #tpu.memory_space<vmem>>, vector<1x8x128xf32>,
    %c3_i32 = arith.constant 3 : i32
    %99 = arith.truncf %94 : vector<8x128xf32> to vector<8x128xbf16>
    %cst_44 = arith.constant dense<0.000000e+00> : vector<8x128xf32>
    %100 = tpu.matmul %99, %4, %cst_44 {dimension_numbers = #tpu.dot_dimension_numbers<[1], [0], [0], [1], [0, 0, 1, 1], [], []>} : vector<8x128xbf16>, vector<128x128xbf16>, vector<8x128xf32> -> vector<8x128xf32>
    %101 = arith.addf %100, %14 : vector<8x128xf32>
    %102 = math.tanh %101 : vector<8x128xf32>
    %103 = arith.truncf %102 : vector<8x128xf32> to vector<8x128xbf16>
    %cst_45 = arith.constant dense<0.000000e+00> : vector<8x128xf32>
    %104 = tpu.matmul %103, %6, %cst_45 {dimension_numbers = #tpu.dot_dimension_numbers<[1], [0], [0], [1], [0, 0, 1, 1], [], []>} : vector<8x128xbf16>, vector<128x128xbf16>, vector<8x128xf32> -> vector<8x128xf32>
    %105 = arith.index_cast %c3_i32 : i32 to index
    %c0_46 = arith.constant 0 : index
    %c0_47 = arith.constant 0 : index
    %106 = vector.load %arg2[%105, %c0_46, %c0_47] : memref<8x8x128xbf16, #tpu.memory_space<vmem>>, vector<1x8x128xbf16>
    %107 = vector.shape_cast %106 : vector<1x8x128xbf16> to vector<8x128xbf16>
    %108 = arith.extf %107 : vector<8x128xbf16> to vector<8x128xf32>
    %109 = arith.addf %104, %108 : vector<8x128xf32>
    %110 = math.tanh %109 : vector<8x128xf32>
    %111 = arith.truncf %110 : vector<8x128xf32> to vector<8x128xbf16>
    %cst_48 = arith.constant dense<0.000000e+00> : vector<8x128xf32>
    %112 = tpu.matmul %111, %8, %cst_48 {dimension_numbers = #tpu.dot_dimension_numbers<[1], [0], [0], [1], [0, 0, 1, 1], [], []>} : vector<8x128xbf16>, vector<128x128xbf16>, vector<8x128xf32> -> vector<8x128xf32>
    %113 = arith.addf %112, %18 : vector<8x128xf32>
    %114 = math.tanh %113 : vector<8x128xf32>
    %115 = arith.truncf %114 : vector<8x128xf32> to vector<8x128xbf16>
    %cst_49 = arith.constant dense<0.000000e+00> : vector<8x128xf32>
    %116 = tpu.matmul %115, %10, %cst_49 {dimension_numbers = #tpu.dot_dimension_numbers<[1], [0], [0], [1], [0, 0, 1, 1], [], []>} : vector<8x128xbf16>, vector<128x128xbf16>, vector<8x128xf32> -> vector<8x128xf32>
    %117 = arith.addf %116, %22 : vector<8x128xf32>
    %118 = math.tanh %117 : vector<8x128xf32>
    %119 = arith.addf %94, %118 : vector<8x128xf32>
    %120 = arith.index_cast %c3_i32 : i32 to index
    %c0_50 = arith.constant 0 : index
    %c0_51 = arith.constant 0 : index
    %121 = vector.load %arg5[%120, %c0_50, %c0_51] : memref<8x8x128xf32, #tpu.memory_space<vmem>>, vector<1x8x128xf32>
    %122 = vector.shape_cast %121 : vector<1x8x128xf32> to vector<8x128xf32>
    %123 = vector.shape_cast %119 : vector<8x128xf32> to vector<1x8x128xf32>
    tpu.vector_store %arg5[%120, %c0_50, %c0_51], %123 {strides = array<i32>} : memref<8x8x128xf32, #tpu.memory_space<vmem>>, vector<1x8x128xf32>,
    %c4_i32 = arith.constant 4 : i32
    %124 = arith.truncf %119 : vector<8x128xf32> to vector<8x128xbf16>
    %cst_52 = arith.constant dense<0.000000e+00> : vector<8x128xf32>
    %125 = tpu.matmul %124, %4, %cst_52 {dimension_numbers = #tpu.dot_dimension_numbers<[1], [0], [0], [1], [0, 0, 1, 1], [], []>} : vector<8x128xbf16>, vector<128x128xbf16>, vector<8x128xf32> -> vector<8x128xf32>
    %126 = arith.addf %125, %14 : vector<8x128xf32>
    %127 = math.tanh %126 : vector<8x128xf32>
    %128 = arith.truncf %127 : vector<8x128xf32> to vector<8x128xbf16>
    %cst_53 = arith.constant dense<0.000000e+00> : vector<8x128xf32>
    %129 = tpu.matmul %128, %6, %cst_53 {dimension_numbers = #tpu.dot_dimension_numbers<[1], [0], [0], [1], [0, 0, 1, 1], [], []>} : vector<8x128xbf16>, vector<128x128xbf16>, vector<8x128xf32> -> vector<8x128xf32>
    %130 = arith.index_cast %c4_i32 : i32 to index
    %c0_54 = arith.constant 0 : index
    %c0_55 = arith.constant 0 : index
    %131 = vector.load %arg2[%130, %c0_54, %c0_55] : memref<8x8x128xbf16, #tpu.memory_space<vmem>>, vector<1x8x128xbf16>
    %132 = vector.shape_cast %131 : vector<1x8x128xbf16> to vector<8x128xbf16>
    %133 = arith.extf %132 : vector<8x128xbf16> to vector<8x128xf32>
    %134 = arith.addf %129, %133 : vector<8x128xf32>
    %135 = math.tanh %134 : vector<8x128xf32>
    %136 = arith.truncf %135 : vector<8x128xf32> to vector<8x128xbf16>
    %cst_56 = arith.constant dense<0.000000e+00> : vector<8x128xf32>
    %137 = tpu.matmul %136, %8, %cst_56 {dimension_numbers = #tpu.dot_dimension_numbers<[1], [0], [0], [1], [0, 0, 1, 1], [], []>} : vector<8x128xbf16>, vector<128x128xbf16>, vector<8x128xf32> -> vector<8x128xf32>
    %138 = arith.addf %137, %18 : vector<8x128xf32>
    %139 = math.tanh %138 : vector<8x128xf32>
    %140 = arith.truncf %139 : vector<8x128xf32> to vector<8x128xbf16>
    %cst_57 = arith.constant dense<0.000000e+00> : vector<8x128xf32>
    %141 = tpu.matmul %140, %10, %cst_57 {dimension_numbers = #tpu.dot_dimension_numbers<[1], [0], [0], [1], [0, 0, 1, 1], [], []>} : vector<8x128xbf16>, vector<128x128xbf16>, vector<8x128xf32> -> vector<8x128xf32>
    %142 = arith.addf %141, %22 : vector<8x128xf32>
    %143 = math.tanh %142 : vector<8x128xf32>
    %144 = arith.addf %119, %143 : vector<8x128xf32>
    %145 = arith.index_cast %c4_i32 : i32 to index
    %c0_58 = arith.constant 0 : index
    %c0_59 = arith.constant 0 : index
    %146 = vector.load %arg5[%145, %c0_58, %c0_59] : memref<8x8x128xf32, #tpu.memory_space<vmem>>, vector<1x8x128xf32>
    %147 = vector.shape_cast %146 : vector<1x8x128xf32> to vector<8x128xf32>
    %148 = vector.shape_cast %144 : vector<8x128xf32> to vector<1x8x128xf32>
    tpu.vector_store %arg5[%145, %c0_58, %c0_59], %148 {strides = array<i32>} : memref<8x8x128xf32, #tpu.memory_space<vmem>>, vector<1x8x128xf32>,
    %c5_i32 = arith.constant 5 : i32
    %149 = arith.truncf %144 : vector<8x128xf32> to vector<8x128xbf16>
    %cst_60 = arith.constant dense<0.000000e+00> : vector<8x128xf32>
    %150 = tpu.matmul %149, %4, %cst_60 {dimension_numbers = #tpu.dot_dimension_numbers<[1], [0], [0], [1], [0, 0, 1, 1], [], []>} : vector<8x128xbf16>, vector<128x128xbf16>, vector<8x128xf32> -> vector<8x128xf32>
    %151 = arith.addf %150, %14 : vector<8x128xf32>
    %152 = math.tanh %151 : vector<8x128xf32>
    %153 = arith.truncf %152 : vector<8x128xf32> to vector<8x128xbf16>
    %cst_61 = arith.constant dense<0.000000e+00> : vector<8x128xf32>
    %154 = tpu.matmul %153, %6, %cst_61 {dimension_numbers = #tpu.dot_dimension_numbers<[1], [0], [0], [1], [0, 0, 1, 1], [], []>} : vector<8x128xbf16>, vector<128x128xbf16>, vector<8x128xf32> -> vector<8x128xf32>
    %155 = arith.index_cast %c5_i32 : i32 to index
    %c0_62 = arith.constant 0 : index
    %c0_63 = arith.constant 0 : index
    %156 = vector.load %arg2[%155, %c0_62, %c0_63] : memref<8x8x128xbf16, #tpu.memory_space<vmem>>, vector<1x8x128xbf16>
    %157 = vector.shape_cast %156 : vector<1x8x128xbf16> to vector<8x128xbf16>
    %158 = arith.extf %157 : vector<8x128xbf16> to vector<8x128xf32>
    %159 = arith.addf %154, %158 : vector<8x128xf32>
    %160 = math.tanh %159 : vector<8x128xf32>
    %161 = arith.truncf %160 : vector<8x128xf32> to vector<8x128xbf16>
    %cst_64 = arith.constant dense<0.000000e+00> : vector<8x128xf32>
    %162 = tpu.matmul %161, %8, %cst_64 {dimension_numbers = #tpu.dot_dimension_numbers<[1], [0], [0], [1], [0, 0, 1, 1], [], []>} : vector<8x128xbf16>, vector<128x128xbf16>, vector<8x128xf32> -> vector<8x128xf32>
    %163 = arith.addf %162, %18 : vector<8x128xf32>
    %164 = math.tanh %163 : vector<8x128xf32>
    %165 = arith.truncf %164 : vector<8x128xf32> to vector<8x128xbf16>
    %cst_65 = arith.constant dense<0.000000e+00> : vector<8x128xf32>
    %166 = tpu.matmul %165, %10, %cst_65 {dimension_numbers = #tpu.dot_dimension_numbers<[1], [0], [0], [1], [0, 0, 1, 1], [], []>} : vector<8x128xbf16>, vector<128x128xbf16>, vector<8x128xf32> -> vector<8x128xf32>
    %167 = arith.addf %166, %22 : vector<8x128xf32>
    %168 = math.tanh %167 : vector<8x128xf32>
    %169 = arith.addf %144, %168 : vector<8x128xf32>
    %170 = arith.index_cast %c5_i32 : i32 to index
    %c0_66 = arith.constant 0 : index
    %c0_67 = arith.constant 0 : index
    %171 = vector.load %arg5[%170, %c0_66, %c0_67] : memref<8x8x128xf32, #tpu.memory_space<vmem>>, vector<1x8x128xf32>
    %172 = vector.shape_cast %171 : vector<1x8x128xf32> to vector<8x128xf32>
    %173 = vector.shape_cast %169 : vector<8x128xf32> to vector<1x8x128xf32>
    tpu.vector_store %arg5[%170, %c0_66, %c0_67], %173 {strides = array<i32>} : memref<8x8x128xf32, #tpu.memory_space<vmem>>, vector<1x8x128xf32>,
    %c6_i32 = arith.constant 6 : i32
    %174 = arith.truncf %169 : vector<8x128xf32> to vector<8x128xbf16>
    %cst_68 = arith.constant dense<0.000000e+00> : vector<8x128xf32>
    %175 = tpu.matmul %174, %4, %cst_68 {dimension_numbers = #tpu.dot_dimension_numbers<[1], [0], [0], [1], [0, 0, 1, 1], [], []>} : vector<8x128xbf16>, vector<128x128xbf16>, vector<8x128xf32> -> vector<8x128xf32>
    %176 = arith.addf %175, %14 : vector<8x128xf32>
    %177 = math.tanh %176 : vector<8x128xf32>
    %178 = arith.truncf %177 : vector<8x128xf32> to vector<8x128xbf16>
    %cst_69 = arith.constant dense<0.000000e+00> : vector<8x128xf32>
    %179 = tpu.matmul %178, %6, %cst_69 {dimension_numbers = #tpu.dot_dimension_numbers<[1], [0], [0], [1], [0, 0, 1, 1], [], []>} : vector<8x128xbf16>, vector<128x128xbf16>, vector<8x128xf32> -> vector<8x128xf32>
    %180 = arith.index_cast %c6_i32 : i32 to index
    %c0_70 = arith.constant 0 : index
    %c0_71 = arith.constant 0 : index
    %181 = vector.load %arg2[%180, %c0_70, %c0_71] : memref<8x8x128xbf16, #tpu.memory_space<vmem>>, vector<1x8x128xbf16>
    %182 = vector.shape_cast %181 : vector<1x8x128xbf16> to vector<8x128xbf16>
    %183 = arith.extf %182 : vector<8x128xbf16> to vector<8x128xf32>
    %184 = arith.addf %179, %183 : vector<8x128xf32>
    %185 = math.tanh %184 : vector<8x128xf32>
    %186 = arith.truncf %185 : vector<8x128xf32> to vector<8x128xbf16>
    %cst_72 = arith.constant dense<0.000000e+00> : vector<8x128xf32>
    %187 = tpu.matmul %186, %8, %cst_72 {dimension_numbers = #tpu.dot_dimension_numbers<[1], [0], [0], [1], [0, 0, 1, 1], [], []>} : vector<8x128xbf16>, vector<128x128xbf16>, vector<8x128xf32> -> vector<8x128xf32>
    %188 = arith.addf %187, %18 : vector<8x128xf32>
    %189 = math.tanh %188 : vector<8x128xf32>
    %190 = arith.truncf %189 : vector<8x128xf32> to vector<8x128xbf16>
    %cst_73 = arith.constant dense<0.000000e+00> : vector<8x128xf32>
    %191 = tpu.matmul %190, %10, %cst_73 {dimension_numbers = #tpu.dot_dimension_numbers<[1], [0], [0], [1], [0, 0, 1, 1], [], []>} : vector<8x128xbf16>, vector<128x128xbf16>, vector<8x128xf32> -> vector<8x128xf32>
    %192 = arith.addf %191, %22 : vector<8x128xf32>
    %193 = math.tanh %192 : vector<8x128xf32>
    %194 = arith.addf %169, %193 : vector<8x128xf32>
    %195 = arith.index_cast %c6_i32 : i32 to index
    %c0_74 = arith.constant 0 : index
    %c0_75 = arith.constant 0 : index
    %196 = vector.load %arg5[%195, %c0_74, %c0_75] : memref<8x8x128xf32, #tpu.memory_space<vmem>>, vector<1x8x128xf32>
    %197 = vector.shape_cast %196 : vector<1x8x128xf32> to vector<8x128xf32>
    %198 = vector.shape_cast %194 : vector<8x128xf32> to vector<1x8x128xf32>
    tpu.vector_store %arg5[%195, %c0_74, %c0_75], %198 {strides = array<i32>} : memref<8x8x128xf32, #tpu.memory_space<vmem>>, vector<1x8x128xf32>,
    %c7_i32 = arith.constant 7 : i32
    %199 = arith.truncf %194 : vector<8x128xf32> to vector<8x128xbf16>
    %cst_76 = arith.constant dense<0.000000e+00> : vector<8x128xf32>
    %200 = tpu.matmul %199, %4, %cst_76 {dimension_numbers = #tpu.dot_dimension_numbers<[1], [0], [0], [1], [0, 0, 1, 1], [], []>} : vector<8x128xbf16>, vector<128x128xbf16>, vector<8x128xf32> -> vector<8x128xf32>
    %201 = arith.addf %200, %14 : vector<8x128xf32>
    %202 = math.tanh %201 : vector<8x128xf32>
    %203 = arith.truncf %202 : vector<8x128xf32> to vector<8x128xbf16>
    %cst_77 = arith.constant dense<0.000000e+00> : vector<8x128xf32>
    %204 = tpu.matmul %203, %6, %cst_77 {dimension_numbers = #tpu.dot_dimension_numbers<[1], [0], [0], [1], [0, 0, 1, 1], [], []>} : vector<8x128xbf16>, vector<128x128xbf16>, vector<8x128xf32> -> vector<8x128xf32>
    %205 = arith.index_cast %c7_i32 : i32 to index
    %c0_78 = arith.constant 0 : index
    %c0_79 = arith.constant 0 : index
    %206 = vector.load %arg2[%205, %c0_78, %c0_79] : memref<8x8x128xbf16, #tpu.memory_space<vmem>>, vector<1x8x128xbf16>
    %207 = vector.shape_cast %206 : vector<1x8x128xbf16> to vector<8x128xbf16>
    %208 = arith.extf %207 : vector<8x128xbf16> to vector<8x128xf32>
    %209 = arith.addf %204, %208 : vector<8x128xf32>
    %210 = math.tanh %209 : vector<8x128xf32>
    %211 = arith.truncf %210 : vector<8x128xf32> to vector<8x128xbf16>
    %cst_80 = arith.constant dense<0.000000e+00> : vector<8x128xf32>
    %212 = tpu.matmul %211, %8, %cst_80 {dimension_numbers = #tpu.dot_dimension_numbers<[1], [0], [0], [1], [0, 0, 1, 1], [], []>} : vector<8x128xbf16>, vector<128x128xbf16>, vector<8x128xf32> -> vector<8x128xf32>
    %213 = arith.addf %212, %18 : vector<8x128xf32>
    %214 = math.tanh %213 : vector<8x128xf32>
    %215 = arith.truncf %214 : vector<8x128xf32> to vector<8x128xbf16>
    %cst_81 = arith.constant dense<0.000000e+00> : vector<8x128xf32>
    %216 = tpu.matmul %215, %10, %cst_81 {dimension_numbers = #tpu.dot_dimension_numbers<[1], [0], [0], [1], [0, 0, 1, 1], [], []>} : vector<8x128xbf16>, vector<128x128xbf16>, vector<8x128xf32> -> vector<8x128xf32>
    %217 = arith.addf %216, %22 : vector<8x128xf32>
    %218 = math.tanh %217 : vector<8x128xf32>
    %219 = arith.addf %194, %218 : vector<8x128xf32>
    %220 = arith.index_cast %c7_i32 : i32 to index
    %c0_82 = arith.constant 0 : index
    %c0_83 = arith.constant 0 : index
    %221 = vector.load %arg5[%220, %c0_82, %c0_83] : memref<8x8x128xf32, #tpu.memory_space<vmem>>, vector<1x8x128xf32>
    %222 = vector.shape_cast %221 : vector<1x8x128xf32> to vector<8x128xf32>
    %223 = vector.shape_cast %219 : vector<8x128xf32> to vector<1x8x128xf32>
    tpu.vector_store %arg5[%220, %c0_82, %c0_83], %223 {strides = array<i32>} : memref<8x8x128xf32, #tpu.memory_space<vmem>>, vector<1x8x128xf32>,
    %c8_i32 = arith.constant 8 : i32
    %c0_84 = arith.constant 0 : index
    %c0_85 = arith.constant 0 : index
    %224 = vector.load %arg6[%c0_84, %c0_85] : memref<8x128xf32, #tpu.memory_space<vmem>>, vector<8x128xf32>
    tpu.vector_store %arg6[%c0_84, %c0_85], %219 {strides = array<i32>} : memref<8x128xf32, #tpu.memory_space<vmem>>, vector<8x128xf32>,
    return
  }
  func.func @transform_0(%arg0: i32, %arg1: i32) -> (i32, i32, i32) {
    %c0_i32 = arith.constant 0 : i32
    %c0_i32_0 = arith.constant 0 : i32
    return %arg1, %arg0, %c0_i32 : i32, i32, i32
  }
  func.func @transform_1(%arg0: i32, %arg1: i32) -> (i32, i32, i32) {
    %c0_i32 = arith.constant 0 : i32
    %c0_i32_0 = arith.constant 0 : i32
    %c0_i32_1 = arith.constant 0 : i32
    %c0_i32_2 = arith.constant 0 : i32
    return %c0_i32, %c0_i32_0, %c0_i32_1 : i32, i32, i32
  }
  func.func @transform_2(%arg0: i32, %arg1: i32) -> (i32, i32, i32) {
    %c0_i32 = arith.constant 0 : i32
    %c0_i32_0 = arith.constant 0 : i32
    %c0_i32_1 = arith.constant 0 : i32
    %c0_i32_2 = arith.constant 0 : i32
    return %c0_i32, %c0_i32_0, %c0_i32_1 : i32, i32, i32
  }
  func.func @transform_3(%arg0: i32, %arg1: i32) -> (i32, i32, i32) {
    %c0_i32 = arith.constant 0 : i32
    %c0_i32_0 = arith.constant 0 : i32
    return %arg1, %arg0, %c0_i32 : i32, i32, i32
  }
}

</mosaic_0001>

<bundles_post_ra>
// kernel: rcell_complex_forward.2
= control target key start
LH: loop header
LB: loop body
LE: loop exit
PB: predicated region body
PF: predicated region fallthrough
CT: control target
= control target key end

     0   :  { %vm54_vm0 = vcmask 1041408   ;;  %vm41_vm1 = vcmask 31744   ;;  %vm150_vm2 = vcmask 130048   ;;  %s452_s1 = inlined_call_operand.vmem [shape: bf16[4,16], index: 1, kind: input, shape index: {}]   ;;  %s453_s0 = inlined_call_operand.vmem [shape: f32[64,4], index: 0, kind: input, shape index: {}]   ;;  %s454_s3 = inlined_call_operand.vmem [shape: bf16[16,128], index: 3, kind: input, shape index: {}]   ;;  %s455_s2 = inlined_call_operand.vmem [shape: f32[1,16], index: 2, kind: input, shape index: {}]   ;;  %s456_s4 = inlined_call_operand.vmem [shape: f32[1,128], index: 4, kind: input, shape index: {}]   ;;  %s457_s5 = inlined_call_operand.vmem [shape: bf16[64,128], index: 5, kind: output, shape index: {}]  }
   0x1   :  { %v33_v0 = vld [vmem:[%s452_s1] sm:$0x3]  ;;  %v22_v2 = vld [vmem:[%s453_s0 + $0x8] sm:$0xff]  ;;  %v23_v5 = vld [vmem:[%s453_s0 + $0x10] sm:$0xff] }
   0x2   :  { %v21_v1 = vld [vmem:[%s453_s0] sm:$0xff]  ;;  %352 = vmatprep.subr.msk.bf16.mxu0 %vm54_vm0, %v33_v0  ;;  %v56_v3 = vsel %vm54_vm0, %v33_v0, 0  ;;  %v24_v6 = vld [vmem:[%s453_s0 + $0x18] sm:$0xff]  ;;  %v26_v9 = vld [vmem:[%s453_s0 + $0x28] sm:$0xff] }
   0x3   :  { %v29_v4 = vpack.c.bf16 %v22_v2, %v21_v1  ;;  %v25_v7 = vld [vmem:[%s453_s0 + $0x20] sm:$0xff]  ;;  %333 = vmatpush3.bf16.msra.mxu0 %v56_v3  ;;  %v30_v8 = vpack.c.bf16 %v24_v6, %v23_v5  ;;  %v27_v11 = vld [vmem:[%s453_s0 + $0x30] sm:$0xff]  ;;  %v28_v12 = vld [vmem:[%s453_s0 + $0x38] sm:$0xff] }
   0x4   :  { %v31_v10 = vpack.c.bf16 %v26_v9, %v25_v7  ;;  %v32_v13 = vpack.c.bf16 %v28_v12, %v27_v11  ;;  %v353_v14 = vld [vmem:[%s454_s3] sm:$0xff]  }
   0x5   :  { %334 = vmatprep.mubr.msk.bf16.mxu0 %vm41_vm1, %v29_v4  ;;  %342 = vmatprep.subr.bf16.mxu1 %v353_v14  ;;  %v272_v15 = vld [vmem:[%s455_s2] ss:$0 sm:$0xff] }
   0x6   :  { %335 = vmatmul.mubr.msk.bf16.vlgmr.msra.gmra.mrb[0].mxu0 %vm41_vm1, %v30_v8  ;;  %343 = vmatpush3.bf16.msra.mxu1 %v353_v14  ;;  %v277_v45 = vld [vmem:[%s456_s4] ss:$0 sm:$0xff] }
   0x7   :  { %338 = vmatprep.mubr.msk.bf16.mxu0 %vm41_vm1, %v31_v10 }
   0xe   :  { %339 = vmatmul.mubr.msk.bf16.gmra.mrb[4].mxu0 %vm41_vm1, %v32_v13 }
  0xd9   :  { %v336_v16 = vpop.f32.mrb[0].mxu0 }
  0xda   :  { %v101_v17 = vadd.f32 %v336_v16, %v272_v15  ;;  %v92_v18 = vpop.f32.mrb[1].mxu0 }
  0xdb   :  { %v93_v19 = vadd.f32 %v272_v15, %v92_v18  ;;  %v337_v20 = vpop.f32.mrb[2].mxu0 }
  0xdc   :  { %354 = vtanh.f32 %v101_v17  ;;  %v104_v21 = vadd.f32 %v337_v20, %v272_v15  ;;  %v95_v22 = vpop.f32.mrb[3].mxu0 }
  0xdd   :  { %356 = vtanh.f32 %v93_v19  ;;  %v96_v23 = vadd.f32 %v272_v15, %v95_v22 }
  0xde   :  { %358 = vtanh.f32 %v104_v21 }
  0xdf   :  { %360 = vtanh.f32 %v96_v23 }
  0xe1   :  { %v340_v24 = vpop.f32.mrb[4].mxu0 }
  0xe2   :  { %v117_v25 = vadd.f32 %v340_v24, %v272_v15  ;;  %v108_v26 = vpop.f32.mrb[5].mxu0 }
  0xe3   :  { %v109_v27 = vadd.f32 %v272_v15, %v108_v26  ;;  %v341_v28 = vpop.f32.mrb[6].mxu0 }
  0xe4   :  { %362 = vtanh.f32 %v117_v25  ;;  %v120_v29 = vadd.f32 %v341_v28, %v272_v15  ;;  %v111_v30 = vpop.f32.mrb[7].mxu0 }
  0xe5   :  { %364 = vtanh.f32 %v109_v27  ;;  %v112_v31 = vadd.f32 %v272_v15, %v111_v30 }
  0xe6   :  { %v355_v32 = vpop.eup %354  ;;  %366 = vtanh.f32 %v120_v29 }
  0xe7   :  { %v357_v33 = vpop.eup %356  ;;  %368 = vtanh.f32 %v112_v31 }
  0xe8   :  { %v359_v34 = vpop.eup %358 }
  0xe9   :  { %v361_v35 = vpop.eup %360  ;;  %v132_v36 = vpack.c.bf16 %v359_v34, %v355_v32 }
  0xea   :  { %v131_v37 = vpack.c.bf16 %v361_v35, %v357_v33 }
  0xec   :  { %344 = vmatprep.mubr.msk.bf16.mxu1 %vm150_vm2, %v131_v37 }
  0xed   :  { %345 = vmatmul.mubr.msk.bf16.vlgmr.msra.gmra.mrb[0].mxu1 %vm150_vm2, %v132_v36 }
  0xee   :  { %v363_v38 = vpop.eup %362 }
  0xef   :  { %v365_v39 = vpop.eup %364 }
  0xf0   :  { %v367_v40 = vpop.eup %366 }
  0xf1   :  { %v369_v41 = vpop.eup %368  ;;  %v134_v42 = vpack.c.bf16 %v367_v40, %v363_v38 }
  0xf2   :  { %v133_v43 = vpack.c.bf16 %v369_v41, %v365_v39 }
  0xf4   :  { %348 = vmatprep.mubr.msk.bf16.mxu1 %vm150_vm2, %v133_v43 }
  0xf5   :  { %349 = vmatmul.mubr.msk.bf16.gmra.mrb[4].mxu1 %vm150_vm2, %v134_v42 }
 0x1c0   :  { %v346_v44 = vpop.f32.mrb[0].mxu1 }
 0x1c1   :  { %v197_v46 = vpop.f32.mrb[1].mxu1  ;;  %v206_v48 = vadd.f32 %v346_v44, %v277_v45 }
 0x1c2   :  { %v347_v47 = vpop.f32.mrb[2].mxu1  ;;  %v198_v51 = vadd.f32 %v277_v45, %v197_v46 }
 0x1c3   :  { %v209_v49 = vadd.f32 %v347_v47, %v277_v45  ;;  %v200_v50 = vpop.f32.mrb[3].mxu1 }
 0x1c4   :  { %v201_v52 = vadd.f32 %v277_v45, %v200_v50 }
 0x1c5   :  { %v307_v53 = vpack.c.bf16 %v209_v49, %v206_v48 }
 0x1c6   :  { %v302_v54 = vpack.c.bf16 %v201_v52, %v198_v51 }
 0x1c7   :  { %319 = vst [vmem:[%s457_s5 + $0x8] sm:$0xff] %v307_v53  }
 0x1c8   :  { %303 = vst [vmem:[%s457_s5] sm:$0xff] %v302_v54   ;;  %v350_v55 = vpop.f32.mrb[4].mxu1 }
 0x1c9   :  { %v213_v56 = vpop.f32.mrb[5].mxu1  ;;  %v222_v58 = vadd.f32 %v350_v55, %v277_v45 }
 0x1ca   :  { %v351_v57 = vpop.f32.mrb[6].mxu1  ;;  %v214_v61 = vadd.f32 %v277_v45, %v213_v56 }
 0x1cb   :  { %v225_v59 = vadd.f32 %v351_v57, %v277_v45  ;;  %v216_v60 = vpop.f32.mrb[7].mxu1 }
 0x1cc   :  { %v217_v62 = vadd.f32 %v277_v45, %v216_v60 }
 0x1cd   :  { %v317_v63 = vpack.c.bf16 %v225_v59, %v222_v58 }
 0x1ce   :  { %v312_v0 = vpack.c.bf16 %v217_v62, %v214_v61 }
 0x1cf   :  { %321 = vst [vmem:[%s457_s5 + $0x18] sm:$0xff] %v317_v63  }
 0x1d0   :  { %320 = vst [vmem:[%s457_s5 + $0x10] sm:$0xff] %v312_v0  }

// kernel: rcell_complex_forward.3
= control target key start
LH: loop header
LB: loop body
LE: loop exit
PB: predicated region body
PF: predicated region fallthrough
CT: control target
= control target key end

     0   :  { %v2892_v1 = vmov 0.0   ;;  %vm2893_vm0 = vmmov 0   ;;  %s3950_s0 = inlined_call_operand.vmem [shape: bf16[8,8,128], index: 0, kind: input, shape index: {}]   ;;  %s3951_s1 = inlined_call_operand.vmem [shape: bf16[4,128,128], index: 1, kind: input, shape index: {}]   ;;  %s3952_s2 = inlined_call_operand.vmem [shape: f32[3,1,128], index: 2, kind: input, shape index: {}]   ;;  %s3953_s3 = inlined_call_operand.hbm [shape: f32[8,8,128], index: 3, kind: output, shape index: {}]  }
   0x1   :  { %v2921_v0 = vld [vmem:[%s3951_s1] sm:$0xff]   ;;  %2091 = vmatprep.subr.bf16.mxu0 %v2892_v1  ;;  %2111 = vmatprep.subr.bf16.mxu1 %v2892_v1  ;;  %v2929_v2 = vld [vmem:[%s3951_s1 + $0x8] sm:$0xff]   ;;  %v2940_v3 = vld [vmem:[%s3951_s1 + $0x10] sm:$0xff]  }
   0x2   :  { %2092 = vmatpush3.bf16.msra.mxu0 %v2921_v0  ;;  %2107 = vmatprep.mubr.msk.bf16.mxu0 %vm2893_vm0, %v2892_v1  ;;  %v2946_v4 = vld [vmem:[%s3951_s1 + $0x40] sm:$0xff]   ;;  %v2951_v5 = vld [vmem:[%s3951_s1 + $0x18] sm:$0xff]   ;;  %v2958_v6 = vld [vmem:[%s3951_s1 + $0x48] sm:$0xff]  }
   0x3   :  { %2093 = vmatprep.subr.bf16.mxu0 %v2892_v1  ;;  %2127 = vmatprep.mubr.msk.bf16.mxu1 %vm2893_vm0, %v2892_v1  ;;  %v2965_v7 = vld [vmem:[%s3951_s1 + $0x20] sm:$0xff]   ;;  %v2970_v8 = vld [vmem:[%s3951_s1 + $0x50] sm:$0xff]   ;;  %v2979_v9 = vld [vmem:[%s3951_s1 + $0x28] sm:$0xff]  }
   0x4   :  { %2112 = vmatpush3.bf16.msra.mxu1 %v2946_v4  ;;  %v2984_v10 = vld [vmem:[%s3951_s1 + $0x58] sm:$0xff]   ;;  %v2993_v11 = vld [vmem:[%s3951_s1 + $0x30] sm:$0xff]  }
   0x5   :  { %2113 = vmatprep.subr.bf16.mxu1 %v2892_v1 }
   0x6   :  { %2094 = vmatpush3.bf16.msra.mxu0 %v2929_v2 }
   0x7   :  { %2095 = vmatprep.subr.bf16.mxu0 %v2892_v1 }
   0x8   :  { %2114 = vmatpush3.bf16.msra.mxu1 %v2958_v6 }
   0x9   :  { %2115 = vmatprep.subr.bf16.mxu1 %v2892_v1 }
   0xa   :  { %2096 = vmatpush3.bf16.msra.mxu0 %v2940_v3 }
   0xb   :  { %2097 = vmatprep.subr.bf16.mxu0 %v2892_v1 }
   0xc   :  { %2116 = vmatpush3.bf16.msra.mxu1 %v2970_v8 }
   0xd   :  { %2117 = vmatprep.subr.bf16.mxu1 %v2892_v1 }
   0xe   :  { %2098 = vmatpush3.bf16.msra.mxu0 %v2951_v5 }
   0xf   :  { %2099 = vmatprep.subr.bf16.mxu0 %v2892_v1 }
  0x10   :  { %2118 = vmatpush3.bf16.msra.mxu1 %v2984_v10 }
  0x11   :  { %2119 = vmatprep.subr.bf16.mxu1 %v2892_v1 }
  0x12   :  { %2100 = vmatpush3.bf16.msra.mxu0 %v2965_v7 }
  0x13   :  { %2101 = vmatprep.subr.bf16.mxu0 %v2892_v1 }
  0x16   :  { %2102 = vmatpush3.bf16.msra.mxu0 %v2979_v9 }
  0x17   :  { %2103 = vmatprep.subr.bf16.mxu0 %v2892_v1 }
  0x18   :  { %8 = vsyncpa [#allocation4], 0  ;;  %v3003_v12 = vld [vmem:[%s3951_s1 + $0x38] sm:$0xff]   ;;  %v2894_v13 = vmov 0.0|0.0   ;;  %v3013_v14 = vld [vmem:[%s3951_s1 + $0x60] sm:$0xff]  }
  0x19   :  { %2120 = vmatpush3.bf16.msra.mxu1 %v3013_v14  ;;  %v3020_v15 = vld [vmem:[%s3951_s1 + $0x68] sm:$0xff]   ;;  %v3027_v16 = vld [vmem:[%s3951_s1 + $0x70] sm:$0xff]   ;;  %v3034_v17 = vld [vmem:[%s3951_s1 + $0x78] sm:$0xff]  }
  0x1a   :  { %2104 = vmatpush3.bf16.msra.mxu0 %v2993_v11  ;;  %2121 = vmatprep.subr.bf16.mxu1 %v2892_v1  ;;  %v3041_v18 = vld [vmem:[%s3951_s1 + $0x80] sm:$0xff]   ;;  %v3047_v19 = vld [vmem:[%s3951_s1 + $0x88] sm:$0xff]   ;;  %v3054_v20 = vld [vmem:[%s3951_s1 + $0x90] sm:$0xff]  }
  0x1b   :  { %2105 = vmatprep.subr.bf16.mxu0 %v2892_v1  ;;  %v3061_v21 = vld [vmem:[%s3951_s1 + $0x98] sm:$0xff]   ;;  %v3069_v22 = vld [vmem:[%s3952_s2] ss:$0 sm:$0xff]  ;;  %v3084_v31 = vld [vmem:[%s3951_s1 + $0xa8] sm:$0xff]  }
  0x1c   :  { %v3077_v30 = vld [vmem:[%s3951_s1 + $0xa0] sm:$0xff]   ;;  %v3091_v32 = vld [vmem:[%s3951_s1 + $0xb0] sm:$0xff]   ;;  %v3098_v33 = vld [vmem:[%s3951_s1 + $0xb8] sm:$0xff]  }
  0x1d   :  { %2122 = vmatpush3.bf16.msra.mxu1 %v3020_v15  ;;  %v3105_v34 = vld [vmem:[%s3951_s1 + $0xc0] sm:$0xff]   ;;  %v3111_v35 = vld [vmem:[%s3951_s1 + $0xc8] sm:$0xff]   ;;  %v3118_v36 = vld [vmem:[%s3951_s1 + $0xd0] sm:$0xff]  }
  0x1e   :  { %2106 = vmatpush3.bf16.msra.mxu0 %v3003_v12  ;;  %2123 = vmatprep.subr.bf16.mxu1 %v2892_v1  ;;  %v3125_v37 = vld [vmem:[%s3951_s1 + $0xd8] sm:$0xff]   ;;  %v3133_v38 = vld [vmem:[%s3950_s0] sm:$0xff]   ;;  %v3164_v48 = vld [vmem:[%s3951_s1 + $0xe8] sm:$0xff]  }
  0x1f   :  { %2131 = vmatprep.subr.bf16.mxu0 %v2892_v1  ;;  %v204_v39 = vunpack.c.l.bf16 %v3133_v38  ;;  %v3157_v47 = vld [vmem:[%s3951_s1 + $0xe0] sm:$0xff]   ;;  %v3171_v49 = vld [vmem:[%s3951_s1 + $0xf0] sm:$0xff]   ;;  %v3178_v50 = vld [vmem:[%s3951_s1 + $0xf8] sm:$0xff]  }
  0x20   :  { %v3185_v51 = vld [vmem:[%s3952_s2 + $0x1] ss:$0 sm:$0xff]  ;;  %v3209_v59 = vld [vmem:[%s3952_s2 + $0x2] ss:$0 sm:$0xff] }
  0x21   :  { %2108 = vmatmul.mubr.bf16.vlgmr.msra.gmra.mrb[0].mxu0 %v2894_v13  ;;  %2124 = vmatpush3.bf16.msra.mxu1 %v3027_v16 }
  0x22   :  { %2147 = vmatprep.mubr.msk.bf16.mxu0 %vm2893_vm0, %v2892_v1  ;;  %2125 = vmatprep.subr.bf16.mxu1 %v2892_v1 }
  0x23   :  { %2132 = vmatpush3.bf16.msra.mxu0 %v3041_v18 }
  0x24   :  { %2133 = vmatprep.subr.bf16.mxu0 %v2892_v1 }
  0x25   :  { %2126 = vmatpush3.bf16.msra.mxu1 %v3034_v17 }
  0x26   :  { %2151 = vmatprep.subr.bf16.mxu1 %v2892_v1 }
  0x27   :  { %2134 = vmatpush3.bf16.msra.mxu0 %v3047_v19 }
  0x28   :  { %2135 = vmatprep.subr.bf16.mxu0 %v2892_v1 }
  0x2b   :  { %2136 = vmatpush3.bf16.msra.mxu0 %v3054_v20 }
  0x2c   :  { %2137 = vmatprep.subr.bf16.mxu0 %v2892_v1 }
  0x2f   :  { %2138 = vmatpush3.bf16.msra.mxu0 %v3061_v21 }
  0x30   :  { %2139 = vmatprep.subr.bf16.mxu0 %v2892_v1 }
  0x33   :  { %2140 = vmatpush3.bf16.msra.mxu0 %v3077_v30 }
  0x34   :  { %2141 = vmatprep.subr.bf16.mxu0 %v2892_v1 }
  0x37   :  { %2142 = vmatpush3.bf16.msra.mxu0 %v3084_v31 }
  0x38   :  { %2143 = vmatprep.subr.bf16.mxu0 %v2892_v1 }
  0x3b   :  { %2144 = vmatpush3.bf16.msra.mxu0 %v3091_v32 }
  0x3c   :  { %2145 = vmatprep.subr.bf16.mxu0 %v2892_v1 }
  0x3f   :  { %2146 = vmatpush3.bf16.msra.mxu0 %v3098_v33 }
  0x40   :  { %2171 = vmatprep.subr.bf16.mxu0 %v2892_v1 }
  0xf4   :  { %v195_v23 = vpop.f32.mrb[0].mxu0 }
  0xf5   :  { %v196_v24 = vadd.f32 %v3069_v22, %v195_v23  ;;  %v2109_v25 = vpop.f32.mrb[1].mxu0 }
  0xf6   :  { %v198_v26 = vpop.f32.mrb[2].mxu0 }
  0xf7   :  { %2769 = vtanh.f32 %v196_v24  ;;  %v2110_v27 = vpop.f32.mrb[3].mxu0 }
 0x101   :  { %v2770_v28 = vpop.eup %2769 }
 0x102   :  { %v202_v29 = vpack.c.bf16 %v2770_v28, %v2770_v28 }
 0x104   :  { %2128 = vmatmul.mubr.bf16.vlgmr.msra.gmra.mrb[0].mxu1 %v202_v29 }
 0x105   :  { %2167 = vmatprep.mubr.msk.bf16.mxu1 %vm2893_vm0, %v2892_v1  ;;  %2152 = vmatpush3.bf16.msra.mxu1 %v3105_v34 }
 0x106   :  { %2153 = vmatprep.subr.bf16.mxu1 %v2892_v1 }
 0x109   :  { %2154 = vmatpush3.bf16.msra.mxu1 %v3111_v35 }
 0x10a   :  { %2155 = vmatprep.subr.bf16.mxu1 %v2892_v1 }
 0x10d   :  { %2156 = vmatpush3.bf16.msra.mxu1 %v3118_v36 }
 0x10e   :  { %2157 = vmatprep.subr.bf16.mxu1 %v2892_v1 }
 0x111   :  { %2158 = vmatpush3.bf16.msra.mxu1 %v3125_v37 }
 0x112   :  { %2159 = vmatprep.subr.bf16.mxu1 %v2892_v1 }
 0x115   :  { %2160 = vmatpush3.bf16.msra.mxu1 %v3157_v47 }
 0x116   :  { %2161 = vmatprep.subr.bf16.mxu1 %v2892_v1 }
 0x119   :  { %2162 = vmatpush3.bf16.msra.mxu1 %v3164_v48 }
 0x11a   :  { %2163 = vmatprep.subr.bf16.mxu1 %v2892_v1 }
 0x11d   :  { %2164 = vmatpush3.bf16.msra.mxu1 %v3171_v49 }
 0x11e   :  { %2165 = vmatprep.subr.bf16.mxu1 %v2892_v1 }
 0x121   :  { %2166 = vmatpush3.bf16.msra.mxu1 %v3178_v50 }
 0x122   :  { %2191 = vmatprep.subr.bf16.mxu1 %v2892_v1 }
 0x1d7   :  { %v287_v40 = vpop.f32.mrb[0].mxu1 }
 0x1d8   :  { %v288_v41 = vadd.f32 %v287_v40, %v204_v39  ;;  %v2129_v42 = vpop.f32.mrb[1].mxu1 }
 0x1d9   :  { %v290_v43 = vpop.f32.mrb[2].mxu1 }
 0x1da   :  { %2771 = vtanh.f32 %v288_v41  ;;  %v2130_v44 = vpop.f32.mrb[3].mxu1  ;;  %v521_v41 = vunpack.c.h.bf16 %v3133_v38 }
 0x1e4   :  { %v2772_v45 = vpop.eup %2771 }
 0x1e5   :  { %v294_v46 = vpack.c.bf16 %v2772_v45, %v2772_v45 }
 0x1e7   :  { %2148 = vmatmul.mubr.bf16.vlgmr.msra.gmra.mrb[4].mxu0 %v294_v46 }
 0x1e8   :  { %2172 = vmatpush3.bf16.msra.mxu0 %v2921_v0  ;;  %2187 = vmatprep.mubr.msk.bf16.mxu0 %vm2893_vm0, %v2892_v1 }
 0x1e9   :  { %2173 = vmatprep.subr.bf16.mxu0 %v2892_v1 }
 0x1ec   :  { %2174 = vmatpush3.bf16.msra.mxu0 %v2929_v2 }
 0x1ed   :  { %2175 = vmatprep.subr.bf16.mxu0 %v2892_v1 }
 0x1f0   :  { %2176 = vmatpush3.bf16.msra.mxu0 %v2940_v3 }
 0x1f1   :  { %2177 = vmatprep.subr.bf16.mxu0 %v2892_v1 }
 0x1f4   :  { %2178 = vmatpush3.bf16.msra.mxu0 %v2951_v5 }
 0x1f5   :  { %2179 = vmatprep.subr.bf16.mxu0 %v2892_v1 }
 0x1f8   :  { %2180 = vmatpush3.bf16.msra.mxu0 %v2965_v7 }
 0x1f9   :  { %2181 = vmatprep.subr.bf16.mxu0 %v2892_v1 }
 0x1fc   :  { %2182 = vmatpush3.bf16.msra.mxu0 %v2979_v9 }
 0x1fd   :  { %2183 = vmatprep.subr.bf16.mxu0 %v2892_v1 }
 0x200   :  { %2184 = vmatpush3.bf16.msra.mxu0 %v2993_v11 }
 0x201   :  { %2185 = vmatprep.subr.bf16.mxu0 %v2892_v1 }
 0x204   :  { %2186 = vmatpush3.bf16.msra.mxu0 %v3003_v12 }
 0x205   :  { %2211 = vmatprep.subr.bf16.mxu0 %v2892_v1 }
 0x2ba   :  { %v377_v52 = vpop.f32.mrb[4].mxu0 }
 0x2bb   :  { %v378_v53 = vadd.f32 %v3185_v51, %v377_v52  ;;  %v2149_v54 = vpop.f32.mrb[5].mxu0 }
 0x2bc   :  { %v380_v55 = vpop.f32.mrb[6].mxu0 }
 0x2bd   :  { %2773 = vtanh.f32 %v378_v53  ;;  %v2150_v56 = vpop.f32.mrb[7].mxu0 }
 0x2c7   :  { %v2774_v57 = vpop.eup %2773 }
 0x2c8   :  { %v384_v58 = vpack.c.bf16 %v2774_v57, %v2774_v57 }
 0x2ca   :  { %2168 = vmatmul.mubr.bf16.vlgmr.msra.gmra.mrb[4].mxu1 %v384_v58 }
 0x2cb   :  { %2192 = vmatpush3.bf16.msra.mxu1 %v2946_v4  ;;  %2207 = vmatprep.mubr.msk.bf16.mxu1 %vm2893_vm0, %v2892_v1 }
 0x2cc   :  { %2193 = vmatprep.subr.bf16.mxu1 %v2892_v1 }
 0x2cf   :  { %2194 = vmatpush3.bf16.msra.mxu1 %v2958_v6 }
 0x2d0   :  { %2195 = vmatprep.subr.bf16.mxu1 %v2892_v1 }
 0x2d3   :  { %2196 = vmatpush3.bf16.msra.mxu1 %v2970_v8 }
 0x2d4   :  { %2197 = vmatprep.subr.bf16.mxu1 %v2892_v1 }
 0x2d7   :  { %2198 = vmatpush3.bf16.msra.mxu1 %v2984_v10 }
 0x2d8   :  { %2199 = vmatprep.subr.bf16.mxu1 %v2892_v1 }
 0x2db   :  { %2200 = vmatpush3.bf16.msra.mxu1 %v3013_v14 }
 0x2dc   :  { %2201 = vmatprep.subr.bf16.mxu1 %v2892_v1 }
 0x2df   :  { %2202 = vmatpush3.bf16.msra.mxu1 %v3020_v15 }
 0x2e0   :  { %2203 = vmatprep.subr.bf16.mxu1 %v2892_v1 }
 0x2e3   :  { %2204 = vmatpush3.bf16.msra.mxu1 %v3027_v16 }
 0x2e4   :  { %2205 = vmatprep.subr.bf16.mxu1 %v2892_v1 }
 0x2e7   :  { %2206 = vmatpush3.bf16.msra.mxu1 %v3034_v17 }
 0x2e8   :  { %2231 = vmatprep.subr.bf16.mxu1 %v2892_v1 }
 0x39d   :  { %v467_v60 = vpop.f32.mrb[4].mxu1 }
 0x39e   :  { %v468_v61 = vadd.f32 %v3209_v59, %v467_v60  ;;  %v2169_v62 = vpop.f32.mrb[5].mxu1 }
 0x39f   :  { %v470_v63 = vpop.f32.mrb[6].mxu1 }
 0x3a0   :  { %2775 = vtanh.f32 %v468_v61  ;;  %v2170_v13 = vpop.f32.mrb[7].mxu1 }
 0x3aa   :  { %v3212_v23 = vpop.eup %2775 }
 0x3ab   :  { %475 = vst [vmem:[#allocation3] sm:$0xff] %v3212_v23  ;;  %v476_v24 = vpack.c.bf16 %v3212_v23, %v3212_v23 }
 0x3ad   :  { %2188 = vmatmul.mubr.bf16.vlgmr.msra.gmra.mrb[8].mxu0 %v476_v24 }
 0x3ae   :  { %2212 = vmatpush3.bf16.msra.mxu0 %v3041_v18  ;;  %2227 = vmatprep.mubr.msk.bf16.mxu0 %vm2893_vm0, %v2892_v1 }
 0x3af   :  { %2213 = vmatprep.subr.bf16.mxu0 %v2892_v1 }
 0x3b2   :  { %2214 = vmatpush3.bf16.msra.mxu0 %v3047_v19 }
 0x3b3   :  { %2215 = vmatprep.subr.bf16.mxu0 %v2892_v1 }
 0x3b6   :  { %2216 = vmatpush3.bf16.msra.mxu0 %v3054_v20 }
 0x3b7   :  { %2217 = vmatprep.subr.bf16.mxu0 %v2892_v1 }
 0x3ba   :  { %2218 = vmatpush3.bf16.msra.mxu0 %v3061_v21 }
 0x3bb   :  { %2219 = vmatprep.subr.bf16.mxu0 %v2892_v1 }
 0x3be   :  { %2220 = vmatpush3.bf16.msra.mxu0 %v3077_v30 }
 0x3bf   :  { %2221 = vmatprep.subr.bf16.mxu0 %v2892_v1 }
 0x3c2   :  { %2222 = vmatpush3.bf16.msra.mxu0 %v3084_v31 }
 0x3c3   :  { %2223 = vmatprep.subr.bf16.mxu0 %v2892_v1 }
 0x3c6   :  { %2224 = vmatpush3.bf16.msra.mxu0 %v3091_v32 }
 0x3c7   :  { %2225 = vmatprep.subr.bf16.mxu0 %v2892_v1 }
 0x3ca   :  { %2226 = vmatpush3.bf16.msra.mxu0 %v3098_v33 }
 0x3cb   :  { %2251 = vmatprep.subr.bf16.mxu0 %v2892_v1 }
 0x480   :  { %v511_v25 = vpop.f32.mrb[8].mxu0 }
 0x481   :  { %v512_v26 = vadd.f32 %v3069_v22, %v511_v25  ;;  %v2189_v27 = vpop.f32.mrb[9].mxu0 }
 0x482   :  { %v514_v28 = vpop.f32.mrb[10].mxu0 }
 0x483   :  { %2777 = vtanh.f32 %v512_v26  ;;  %v2190_v29 = vpop.f32.mrb[11].mxu0 }
 0x48d   :  { %v2778_v39 = vpop.eup %2777 }
 0x48e   :  { %v518_v40 = vpack.c.bf16 %v2778_v39, %v2778_v39 }
 0x490   :  { %2208 = vmatmul.mubr.bf16.vlgmr.msra.gmra.mrb[8].mxu1 %v518_v40 }
 0x491   :  { %2232 = vmatpush3.bf16.msra.mxu1 %v3105_v34  ;;  %2247 = vmatprep.mubr.msk.bf16.mxu1 %vm2893_vm0, %v2892_v1 }
 0x492   :  { %2233 = vmatprep.subr.bf16.mxu1 %v2892_v1 }
 0x495   :  { %2234 = vmatpush3.bf16.msra.mxu1 %v3111_v35 }
 0x496   :  { %2235 = vmatprep.subr.bf16.mxu1 %v2892_v1 }
 0x499   :  { %2236 = vmatpush3.bf16.msra.mxu1 %v3118_v36 }
 0x49a   :  { %2237 = vmatprep.subr.bf16.mxu1 %v2892_v1 }
 0x49d   :  { %2238 = vmatpush3.bf16.msra.mxu1 %v3125_v37 }
 0x49e   :  { %2239 = vmatprep.subr.bf16.mxu1 %v2892_v1 }
 0x4a1   :  { %2240 = vmatpush3.bf16.msra.mxu1 %v3157_v47 }
 0x4a2   :  { %2241 = vmatprep.subr.bf16.mxu1 %v2892_v1 }
 0x4a5   :  { %2242 = vmatpush3.bf16.msra.mxu1 %v3164_v48 }
 0x4a6   :  { %2243 = vmatprep.subr.bf16.mxu1 %v2892_v1 }
 0x4a9   :  { %2244 = vmatpush3.bf16.msra.mxu1 %v3171_v49 }
 0x4aa   :  { %2245 = vmatprep.subr.bf16.mxu1 %v2892_v1 }
 0x4ad   :  { %2246 = vmatpush3.bf16.msra.mxu1 %v3178_v50 }
 0x4ae   :  { %2271 = vmatprep.subr.bf16.mxu1 %v2892_v1 }
 0x563   :  { %v556_v42 = vpop.f32.mrb[8].mxu1 }
 0x564   :  { %v557_v43 = vadd.f32 %v556_v42, %v521_v41  ;;  %v2209_v44 = vpop.f32.mrb[9].mxu1 }
 0x565   :  { %v559_v45 = vpop.f32.mrb[10].mxu1 }
 0x566   :  { %2779 = vtanh.f32 %v557_v43  ;;  %v2210_v46 = vpop.f32.mrb[11].mxu1  ;;  %v3339_v43 = vld [vmem:[%s3950_s0 + $0x8] sm:$0xff]  }
 0x567   :  { %v695_v44 = vunpack.c.l.bf16 %v3339_v43 }
 0x570   :  { %v2780_v52 = vpop.eup %2779 }
 0x571   :  { %v563_v53 = vpack.c.bf16 %v2780_v52, %v2780_v52 }
 0x573   :  { %2228 = vmatmul.mubr.bf16.vlgmr.msra.gmra.mrb[12].mxu0 %v563_v53 }
 0x574   :  { %2252 = vmatpush3.bf16.msra.mxu0 %v2921_v0  ;;  %2267 = vmatprep.mubr.msk.bf16.mxu0 %vm2893_vm0, %v2892_v1 }
 0x575   :  { %2253 = vmatprep.subr.bf16.mxu0 %v2892_v1 }
 0x578   :  { %2254 = vmatpush3.bf16.msra.mxu0 %v2929_v2 }
 0x579   :  { %2255 = vmatprep.subr.bf16.mxu0 %v2892_v1 }
 0x57c   :  { %2256 = vmatpush3.bf16.msra.mxu0 %v2940_v3 }
 0x57d   :  { %2257 = vmatprep.subr.bf16.mxu0 %v2892_v1 }
 0x580   :  { %2258 = vmatpush3.bf16.msra.mxu0 %v2951_v5 }
 0x581   :  { %2259 = vmatprep.subr.bf16.mxu0 %v2892_v1 }
 0x584   :  { %2260 = vmatpush3.bf16.msra.mxu0 %v2965_v7 }
 0x585   :  { %2261 = vmatprep.subr.bf16.mxu0 %v2892_v1 }
 0x588   :  { %2262 = vmatpush3.bf16.msra.mxu0 %v2979_v9 }
 0x589   :  { %2263 = vmatprep.subr.bf16.mxu0 %v2892_v1 }
 0x58c   :  { %2264 = vmatpush3.bf16.msra.mxu0 %v2993_v11 }
 0x58d   :  { %2265 = vmatprep.subr.bf16.mxu0 %v2892_v1 }
 0x590   :  { %2266 = vmatpush3.bf16.msra.mxu0 %v3003_v12 }
 0x591   :  { %2291 = vmatprep.subr.bf16.mxu0 %v2892_v1 }
 0x646   :  { %v598_v38 = vpop.f32.mrb[12].mxu0 }
 0x647   :  { %v599_v54 = vadd.f32 %v3185_v51, %v598_v38  ;;  %v2229_v55 = vpop.f32.mrb[13].mxu0 }
 0x648   :  { %v601_v56 = vpop.f32.mrb[14].mxu0 }
 0x649   :  { %2781 = vtanh.f32 %v599_v54  ;;  %v2230_v57 = vpop.f32.mrb[15].mxu0 }
 0x653   :  { %v2782_v58 = vpop.eup %2781 }
 0x654   :  { %v605_v60 = vpack.c.bf16 %v2782_v58, %v2782_v58 }
 0x656   :  { %2248 = vmatmul.mubr.bf16.vlgmr.msra.gmra.mrb[12].mxu1 %v605_v60 }
 0x657   :  { %2272 = vmatpush3.bf16.msra.mxu1 %v2946_v4  ;;  %2287 = vmatprep.mubr.msk.bf16.mxu1 %vm2893_vm0, %v2892_v1 }
 0x658   :  { %2273 = vmatprep.subr.bf16.mxu1 %v2892_v1 }
 0x65b   :  { %2274 = vmatpush3.bf16.msra.mxu1 %v2958_v6 }
 0x65c   :  { %2275 = vmatprep.subr.bf16.mxu1 %v2892_v1 }
 0x65f   :  { %2276 = vmatpush3.bf16.msra.mxu1 %v2970_v8 }
 0x660   :  { %2277 = vmatprep.subr.bf16.mxu1 %v2892_v1 }
 0x663   :  { %2278 = vmatpush3.bf16.msra.mxu1 %v2984_v10 }
 0x664   :  { %2279 = vmatprep.subr.bf16.mxu1 %v2892_v1 }
 0x667   :  { %2280 = vmatpush3.bf16.msra.mxu1 %v3013_v14 }
 0x668   :  { %2281 = vmatprep.subr.bf16.mxu1 %v2892_v1 }
 0x66b   :  { %2282 = vmatpush3.bf16.msra.mxu1 %v3020_v15 }
 0x66c   :  { %2283 = vmatprep.subr.bf16.mxu1 %v2892_v1 }
 0x66f   :  { %2284 = vmatpush3.bf16.msra.mxu1 %v3027_v16 }
 0x670   :  { %2285 = vmatprep.subr.bf16.mxu1 %v2892_v1 }
 0x673   :  { %2286 = vmatpush3.bf16.msra.mxu1 %v3034_v17 }
 0x674   :  { %2311 = vmatprep.subr.bf16.mxu1 %v2892_v1 }
 0x729   :  { %v640_v61 = vpop.f32.mrb[12].mxu1 }
 0x72a   :  { %v641_v62 = vadd.f32 %v3209_v59, %v640_v61  ;;  %v2249_v63 = vpop.f32.mrb[13].mxu1 }
 0x72b   :  { %v643_v13 = vpop.f32.mrb[14].mxu1 }
 0x72c   :  { %2783 = vtanh.f32 %v641_v62  ;;  %v2250_v24 = vpop.f32.mrb[15].mxu1 }
 0x736   :  { %v2784_v25 = vpop.eup %2783 }
 0x737   :  { %v3294_v26 = vadd.f32 %v2784_v25, %v3212_v23 }
 0x739   :  { %649 = vst [vmem:[#allocation3 + $0x8] sm:$0xff] %v3294_v26  ;;  %v650_v27 = vpack.c.bf16 %v3294_v26, %v3294_v26 }
 0x73b   :  { %2268 = vmatmul.mubr.bf16.vlgmr.msra.gmra.mrb[16].mxu0 %v650_v27 }
 0x73c   :  { %2292 = vmatpush3.bf16.msra.mxu0 %v3041_v18  ;;  %2307 = vmatprep.mubr.msk.bf16.mxu0 %vm2893_vm0, %v2892_v1 }
 0x73d   :  { %2293 = vmatprep.subr.bf16.mxu0 %v2892_v1 }
 0x740   :  { %2294 = vmatpush3.bf16.msra.mxu0 %v3047_v19 }
 0x741   :  { %2295 = vmatprep.subr.bf16.mxu0 %v2892_v1 }
 0x744   :  { %2296 = vmatpush3.bf16.msra.mxu0 %v3054_v20 }
 0x745   :  { %2297 = vmatprep.subr.bf16.mxu0 %v2892_v1 }
 0x748   :  { %2298 = vmatpush3.bf16.msra.mxu0 %v3061_v21 }
 0x749   :  { %2299 = vmatprep.subr.bf16.mxu0 %v2892_v1 }
 0x74c   :  { %2300 = vmatpush3.bf16.msra.mxu0 %v3077_v30 }
 0x74d   :  { %2301 = vmatprep.subr.bf16.mxu0 %v2892_v1 }
 0x750   :  { %2302 = vmatpush3.bf16.msra.mxu0 %v3084_v31 }
 0x751   :  { %2303 = vmatprep.subr.bf16.mxu0 %v2892_v1 }
 0x754   :  { %2304 = vmatpush3.bf16.msra.mxu0 %v3091_v32 }
 0x755   :  { %2305 = vmatprep.subr.bf16.mxu0 %v2892_v1 }
 0x758   :  { %2306 = vmatpush3.bf16.msra.mxu0 %v3098_v33 }
 0x759   :  { %2331 = vmatprep.subr.bf16.mxu0 %v2892_v1 }
 0x80e   :  { %v685_v23 = vpop.f32.mrb[16].mxu0 }
 0x80f   :  { %v686_v28 = vadd.f32 %v3069_v22, %v685_v23  ;;  %v2269_v29 = vpop.f32.mrb[17].mxu0 }
 0x810   :  { %v688_v39 = vpop.f32.mrb[18].mxu0 }
 0x811   :  { %2785 = vtanh.f32 %v686_v28  ;;  %v2270_v40 = vpop.f32.mrb[19].mxu0 }
 0x81b   :  { %v2786_v41 = vpop.eup %2785 }
 0x81c   :  { %v692_v42 = vpack.c.bf16 %v2786_v41, %v2786_v41 }
 0x81e   :  { %2288 = vmatmul.mubr.bf16.vlgmr.msra.gmra.mrb[16].mxu1 %v692_v42 }
 0x81f   :  { %2312 = vmatpush3.bf16.msra.mxu1 %v3105_v34  ;;  %2327 = vmatprep.mubr.msk.bf16.mxu1 %vm2893_vm0, %v2892_v1 }
 0x820   :  { %2313 = vmatprep.subr.bf16.mxu1 %v2892_v1 }
 0x823   :  { %2314 = vmatpush3.bf16.msra.mxu1 %v3111_v35 }
 0x824   :  { %2315 = vmatprep.subr.bf16.mxu1 %v2892_v1 }
 0x827   :  { %2316 = vmatpush3.bf16.msra.mxu1 %v3118_v36 }
 0x828   :  { %2317 = vmatprep.subr.bf16.mxu1 %v2892_v1 }
 0x82b   :  { %2318 = vmatpush3.bf16.msra.mxu1 %v3125_v37 }
 0x82c   :  { %2319 = vmatprep.subr.bf16.mxu1 %v2892_v1 }
 0x82f   :  { %2320 = vmatpush3.bf16.msra.mxu1 %v3157_v47 }
 0x830   :  { %2321 = vmatprep.subr.bf16.mxu1 %v2892_v1 }
 0x833   :  { %2322 = vmatpush3.bf16.msra.mxu1 %v3164_v48 }
 0x834   :  { %2323 = vmatprep.subr.bf16.mxu1 %v2892_v1 }
 0x837   :  { %2324 = vmatpush3.bf16.msra.mxu1 %v3171_v49 }
 0x838   :  { %2325 = vmatprep.subr.bf16.mxu1 %v2892_v1 }
 0x83b   :  { %2326 = vmatpush3.bf16.msra.mxu1 %v3178_v50 }
 0x83c   :  { %2351 = vmatprep.subr.bf16.mxu1 %v2892_v1 }
 0x8f1   :  { %v730_v45 = vpop.f32.mrb[16].mxu1 }
 0x8f2   :  { %v731_v46 = vadd.f32 %v730_v45, %v695_v44  ;;  %v2289_v52 = vpop.f32.mrb[17].mxu1 }
 0x8f3   :  { %v733_v53 = vpop.f32.mrb[18].mxu1 }
 0x8f4   :  { %2787 = vtanh.f32 %v731_v46  ;;  %v2290_v38 = vpop.f32.mrb[19].mxu1  ;;  %v869_v46 = vunpack.c.h.bf16 %v3339_v43 }
 0x8fe   :  { %v2788_v54 = vpop.eup %2787 }
 0x8ff   :  { %v737_v55 = vpack.c.bf16 %v2788_v54, %v2788_v54 }
 0x901   :  { %2308 = vmatmul.mubr.bf16.vlgmr.msra.gmra.mrb[20].mxu0 %v737_v55 }
 0x902   :  { %2332 = vmatpush3.bf16.msra.mxu0 %v2921_v0  ;;  %2347 = vmatprep.mubr.msk.bf16.mxu0 %vm2893_vm0, %v2892_v1 }
 0x903   :  { %2333 = vmatprep.subr.bf16.mxu0 %v2892_v1 }
 0x906   :  { %2334 = vmatpush3.bf16.msra.mxu0 %v2929_v2 }
 0x907   :  { %2335 = vmatprep.subr.bf16.mxu0 %v2892_v1 }
 0x90a   :  { %2336 = vmatpush3.bf16.msra.mxu0 %v2940_v3 }
 0x90b   :  { %2337 = vmatprep.subr.bf16.mxu0 %v2892_v1 }
 0x90e   :  { %2338 = vmatpush3.bf16.msra.mxu0 %v2951_v5 }
 0x90f   :  { %2339 = vmatprep.subr.bf16.mxu0 %v2892_v1 }
 0x912   :  { %2340 = vmatpush3.bf16.msra.mxu0 %v2965_v7 }
 0x913   :  { %2341 = vmatprep.subr.bf16.mxu0 %v2892_v1 }
 0x916   :  { %2342 = vmatpush3.bf16.msra.mxu0 %v2979_v9 }
 0x917   :  { %2343 = vmatprep.subr.bf16.mxu0 %v2892_v1 }
 0x91a   :  { %2344 = vmatpush3.bf16.msra.mxu0 %v2993_v11 }
 0x91b   :  { %2345 = vmatprep.subr.bf16.mxu0 %v2892_v1 }
 0x91e   :  { %2346 = vmatpush3.bf16.msra.mxu0 %v3003_v12 }
 0x91f   :  { %2371 = vmatprep.subr.bf16.mxu0 %v2892_v1 }
 0x9d4   :  { %v772_v0 = vpop.f32.mrb[20].mxu0 }
 0x9d5   :  { %v773_v56 = vadd.f32 %v3185_v51, %v772_v0  ;;  %v2309_v57 = vpop.f32.mrb[21].mxu0 }
 0x9d6   :  { %v775_v58 = vpop.f32.mrb[22].mxu0  ;;  %v3427_v57 = vld [vmem:[%s3951_s1] sm:$0xff]  }
 0x9d7   :  { %2789 = vtanh.f32 %v773_v56  ;;  %v2310_v60 = vpop.f32.mrb[23].mxu0 }
 0x9e1   :  { %v2790_v61 = vpop.eup %2789 }
 0x9e2   :  { %v779_v62 = vpack.c.bf16 %v2790_v61, %v2790_v61  ;;  %v3551_v61 = vld [vmem:[%s3951_s1 + $0x28] sm:$0xff]  }
 0x9e4   :  { %2328 = vmatmul.mubr.bf16.vlgmr.msra.gmra.mrb[20].mxu1 %v779_v62  ;;  %v3558_v62 = vld [vmem:[%s3951_s1 + $0x30] sm:$0xff]  }
 0x9e5   :  { %2352 = vmatpush3.bf16.msra.mxu1 %v2946_v4  ;;  %2367 = vmatprep.mubr.msk.bf16.mxu1 %vm2893_vm0, %v2892_v1 }
 0x9e6   :  { %2353 = vmatprep.subr.bf16.mxu1 %v2892_v1 }
 0x9e9   :  { %2354 = vmatpush3.bf16.msra.mxu1 %v2958_v6 }
 0x9ea   :  { %2355 = vmatprep.subr.bf16.mxu1 %v2892_v1 }
 0x9ed   :  { %2356 = vmatpush3.bf16.msra.mxu1 %v2970_v8 }
 0x9ee   :  { %2357 = vmatprep.subr.bf16.mxu1 %v2892_v1 }
 0x9f1   :  { %2358 = vmatpush3.bf16.msra.mxu1 %v2984_v10 }
 0x9f2   :  { %2359 = vmatprep.subr.bf16.mxu1 %v2892_v1 }
 0x9f5   :  { %2360 = vmatpush3.bf16.msra.mxu1 %v3013_v14 }
 0x9f6   :  { %2361 = vmatprep.subr.bf16.mxu1 %v2892_v1 }
 0x9f9   :  { %2362 = vmatpush3.bf16.msra.mxu1 %v3020_v15 }
 0x9fa   :  { %2363 = vmatprep.subr.bf16.mxu1 %v2892_v1 }
 0x9fd   :  { %2364 = vmatpush3.bf16.msra.mxu1 %v3027_v16 }
 0x9fe   :  { %2365 = vmatprep.subr.bf16.mxu1 %v2892_v1 }
 0xa01   :  { %2366 = vmatpush3.bf16.msra.mxu1 %v3034_v17 }
 0xa02   :  { %2391 = vmatprep.subr.bf16.mxu1 %v2892_v1 }
 0xab7   :  { %v814_v63 = vpop.f32.mrb[20].mxu1 }
 0xab8   :  { %v815_v13 = vadd.f32 %v3209_v59, %v814_v63  ;;  %v2329_v24 = vpop.f32.mrb[21].mxu1  ;;  %v3565_v63 = vld [vmem:[%s3951_s1 + $0x38] sm:$0xff]  }
 0xab9   :  { %v817_v25 = vpop.f32.mrb[22].mxu1 }
 0xaba   :  { %2791 = vtanh.f32 %v815_v13  ;;  %v2330_v27 = vpop.f32.mrb[23].mxu1 }
 0xac4   :  { %v2792_v23 = vpop.eup %2791 }
 0xac5   :  { %v3381_v28 = vadd.f32 %v2792_v23, %v3294_v26 }
 0xac7   :  { %823 = vst [vmem:[#allocation3 + $0x10] sm:$0xff] %v3381_v28  ;;  %v824_v29 = vpack.c.bf16 %v3381_v28, %v3381_v28 }
 0xac9   :  { %2348 = vmatmul.mubr.bf16.vlgmr.msra.gmra.mrb[24].mxu0 %v824_v29 }
 0xaca   :  { %2372 = vmatpush3.bf16.msra.mxu0 %v3041_v18  ;;  %2387 = vmatprep.mubr.msk.bf16.mxu0 %vm2893_vm0, %v2892_v1 }
 0xacb   :  { %2373 = vmatprep.subr.bf16.mxu0 %v2892_v1 }
 0xace   :  { %2374 = vmatpush3.bf16.msra.mxu0 %v3047_v19 }
 0xacf   :  { %2375 = vmatprep.subr.bf16.mxu0 %v2892_v1 }
 0xad2   :  { %2376 = vmatpush3.bf16.msra.mxu0 %v3054_v20 }
 0xad3   :  { %2377 = vmatprep.subr.bf16.mxu0 %v2892_v1 }
 0xad6   :  { %2378 = vmatpush3.bf16.msra.mxu0 %v3061_v21 }
 0xad7   :  { %2379 = vmatprep.subr.bf16.mxu0 %v2892_v1 }
 0xada   :  { %2380 = vmatpush3.bf16.msra.mxu0 %v3077_v30 }
 0xadb   :  { %2381 = vmatprep.subr.bf16.mxu0 %v2892_v1 }
 0xade   :  { %2382 = vmatpush3.bf16.msra.mxu0 %v3084_v31 }
 0xadf   :  { %2383 = vmatprep.subr.bf16.mxu0 %v2892_v1 }
 0xae2   :  { %2384 = vmatpush3.bf16.msra.mxu0 %v3091_v32 }
 0xae3   :  { %2385 = vmatprep.subr.bf16.mxu0 %v2892_v1 }
 0xae6   :  { %2386 = vmatpush3.bf16.msra.mxu0 %v3098_v33 }
 0xae7   :  { %2411 = vmatprep.subr.bf16.mxu0 %v2892_v1 }
 0xb9c   :  { %v859_v26 = vpop.f32.mrb[24].mxu0 }
 0xb9d   :  { %v860_v39 = vadd.f32 %v3069_v22, %v859_v26  ;;  %v2349_v40 = vpop.f32.mrb[25].mxu0  ;;  %v3573_v26 = vld [vmem:[%s3951_s1 + $0x40] sm:$0xff]  }
 0xb9e   :  { %v862_v41 = vpop.f32.mrb[26].mxu0  ;;  %v3596_v40 = vld [vmem:[%s3951_s1 + $0x58] sm:$0xff]  }
 0xb9f   :  { %2793 = vtanh.f32 %v860_v39  ;;  %v2350_v42 = vpop.f32.mrb[27].mxu0  ;;  %v3589_v39 = vld [vmem:[%s3951_s1 + $0x50] sm:$0xff]   ;;  %v3603_v41 = vld [vmem:[%s3951_s1 + $0x60] sm:$0xff]  }
 0xba0   :  { %v3610_v42 = vld [vmem:[%s3951_s1 + $0x68] sm:$0xff]  }
 0xba9   :  { %v2794_v44 = vpop.eup %2793 }
 0xbaa   :  { %v866_v45 = vpack.c.bf16 %v2794_v44, %v2794_v44  ;;  %v3617_v44 = vld [vmem:[%s3951_s1 + $0x70] sm:$0xff]  }
 0xbac   :  { %2368 = vmatmul.mubr.bf16.vlgmr.msra.gmra.mrb[24].mxu1 %v866_v45  ;;  %v3624_v45 = vld [vmem:[%s3951_s1 + $0x78] sm:$0xff]  }
 0xbad   :  { %2392 = vmatpush3.bf16.msra.mxu1 %v3105_v34  ;;  %2407 = vmatprep.mubr.msk.bf16.mxu1 %vm2893_vm0, %v2892_v1 }
 0xbae   :  { %2393 = vmatprep.subr.bf16.mxu1 %v2892_v1 }
 0xbb1   :  { %2394 = vmatpush3.bf16.msra.mxu1 %v3111_v35 }
 0xbb2   :  { %2395 = vmatprep.subr.bf16.mxu1 %v2892_v1 }
 0xbb5   :  { %2396 = vmatpush3.bf16.msra.mxu1 %v3118_v36 }
 0xbb6   :  { %2397 = vmatprep.subr.bf16.mxu1 %v2892_v1 }
 0xbb9   :  { %2398 = vmatpush3.bf16.msra.mxu1 %v3125_v37 }
 0xbba   :  { %2399 = vmatprep.subr.bf16.mxu1 %v2892_v1 }
 0xbbd   :  { %2400 = vmatpush3.bf16.msra.mxu1 %v3157_v47 }
 0xbbe   :  { %2401 = vmatprep.subr.bf16.mxu1 %v2892_v1 }
 0xbc1   :  { %2402 = vmatpush3.bf16.msra.mxu1 %v3164_v48 }
 0xbc2   :  { %2403 = vmatprep.subr.bf16.mxu1 %v2892_v1 }
 0xbc5   :  { %2404 = vmatpush3.bf16.msra.mxu1 %v3171_v49 }
 0xbc6   :  { %2405 = vmatprep.subr.bf16.mxu1 %v2892_v1 }
 0xbc9   :  { %2406 = vmatpush3.bf16.msra.mxu1 %v3178_v50 }
 0xbca   :  { %2431 = vmatprep.subr.bf16.mxu1 %v2892_v1 }
 0xc7f   :  { %v904_v52 = vpop.f32.mrb[24].mxu1 }
 0xc80   :  { %v905_v53 = vadd.f32 %v904_v52, %v869_v46  ;;  %v2369_v38 = vpop.f32.mrb[25].mxu1 }
 0xc81   :  { %v907_v54 = vpop.f32.mrb[26].mxu1 }
 0xc82   :  { %2795 = vtanh.f32 %v905_v53  ;;  %v2370_v55 = vpop.f32.mrb[27].mxu1 }
 0xc8c   :  { %v2796_v0 = vpop.eup %2795 }
 0xc8d   :  { %v911_v56 = vpack.c.bf16 %v2796_v0, %v2796_v0 }
 0xc8f   :  { %2388 = vmatmul.mubr.bf16.vlgmr.msra.gmra.mrb[28].mxu0 %v911_v56 }
 0xc90   :  { %2412 = vmatpush3.bf16.msra.mxu0 %v3427_v57  ;;  %2427 = vmatprep.mubr.msk.bf16.mxu0 %vm2893_vm0, %v2892_v1 }
 0xc91   :  { %2413 = vmatprep.subr.bf16.mxu0 %v2892_v1 }
 0xc94   :  { %2414 = vmatpush3.bf16.msra.mxu0 %v2929_v2 }
 0xc95   :  { %2415 = vmatprep.subr.bf16.mxu0 %v2892_v1 }
 0xc98   :  { %2416 = vmatpush3.bf16.msra.mxu0 %v2940_v3 }
 0xc99   :  { %2417 = vmatprep.subr.bf16.mxu0 %v2892_v1 }
 0xc9c   :  { %2418 = vmatpush3.bf16.msra.mxu0 %v2951_v5 }
 0xc9d   :  { %2419 = vmatprep.subr.bf16.mxu0 %v2892_v1 }
 0xca0   :  { %2420 = vmatpush3.bf16.msra.mxu0 %v2965_v7 }
 0xca1   :  { %2421 = vmatprep.subr.bf16.mxu0 %v2892_v1 }
 0xca4   :  { %2422 = vmatpush3.bf16.msra.mxu0 %v2979_v9 }
 0xca5   :  { %2423 = vmatprep.subr.bf16.mxu0 %v2892_v1 }
 0xca8   :  { %2424 = vmatpush3.bf16.msra.mxu0 %v2993_v11 }
 0xca9   :  { %2425 = vmatprep.subr.bf16.mxu0 %v2892_v1 }
 0xcac   :  { %2426 = vmatpush3.bf16.msra.mxu0 %v3003_v12 }
 0xcad   :  { %2451 = vmatprep.subr.bf16.mxu0 %v2892_v1 }
 0xd62   :  { %v946_v2 = vpop.f32.mrb[28].mxu0 }
 0xd63   :  { %v947_v3 = vadd.f32 %v3185_v51, %v946_v2  ;;  %v2389_v5 = vpop.f32.mrb[29].mxu0  ;;  %v3638_v2 = vld [vmem:[%s3951_s1 + $0x80] sm:$0xff]  }
 0xd64   :  { %v949_v43 = vpop.f32.mrb[30].mxu0  ;;  %v3661_v5 = vld [vmem:[%s3951_s1 + $0x98] sm:$0xff]  }
 0xd65   :  { %2797 = vtanh.f32 %v947_v3  ;;  %v2390_v7 = vpop.f32.mrb[31].mxu0  ;;  %v3654_v3 = vld [vmem:[%s3951_s1 + $0x90] sm:$0xff]   ;;  %v3668_v43 = vld [vmem:[%s3951_s1 + $0xa0] sm:$0xff]  }
 0xd66   :  { %v3675_v7 = vld [vmem:[%s3951_s1 + $0xa8] sm:$0xff]  }
 0xd6f   :  { %v2798_v58 = vpop.eup %2797 }
 0xd70   :  { %v953_v60 = vpack.c.bf16 %v2798_v58, %v2798_v58  ;;  %v3682_v58 = vld [vmem:[%s3951_s1 + $0xb0] sm:$0xff]  }
 0xd72   :  { %2408 = vmatmul.mubr.bf16.vlgmr.msra.gmra.mrb[28].mxu1 %v953_v60  ;;  %v3689_v60 = vld [vmem:[%s3951_s1 + $0xb8] sm:$0xff]  }
 0xd73   :  { %2432 = vmatpush3.bf16.msra.mxu1 %v2946_v4  ;;  %2447 = vmatprep.mubr.msk.bf16.mxu1 %vm2893_vm0, %v2892_v1 }
 0xd74   :  { %2433 = vmatprep.subr.bf16.mxu1 %v2892_v1 }
 0xd77   :  { %2434 = vmatpush3.bf16.msra.mxu1 %v2958_v6 }
 0xd78   :  { %2435 = vmatprep.subr.bf16.mxu1 %v2892_v1 }
 0xd7b   :  { %2436 = vmatpush3.bf16.msra.mxu1 %v2970_v8 }
 0xd7c   :  { %2437 = vmatprep.subr.bf16.mxu1 %v2892_v1 }
 0xd7f   :  { %2438 = vmatpush3.bf16.msra.mxu1 %v2984_v10 }
 0xd80   :  { %2439 = vmatprep.subr.bf16.mxu1 %v2892_v1 }
 0xd83   :  { %2440 = vmatpush3.bf16.msra.mxu1 %v3013_v14 }
 0xd84   :  { %2441 = vmatprep.subr.bf16.mxu1 %v2892_v1 }
 0xd87   :  { %2442 = vmatpush3.bf16.msra.mxu1 %v3020_v15 }
 0xd88   :  { %2443 = vmatprep.subr.bf16.mxu1 %v2892_v1 }
 0xd8b   :  { %2444 = vmatpush3.bf16.msra.mxu1 %v3027_v16 }
 0xd8c   :  { %2445 = vmatprep.subr.bf16.mxu1 %v2892_v1 }
 0xd8f   :  { %2446 = vmatpush3.bf16.msra.mxu1 %v3034_v17 }
 0xd90   :  { %2471 = vmatprep.subr.bf16.mxu1 %v2892_v1 }
 0xe45   :  { %v988_v4 = vpop.f32.mrb[28].mxu1 }
 0xe46   :  { %v989_v6 = vadd.f32 %v3209_v59, %v988_v4  ;;  %v2409_v8 = vpop.f32.mrb[29].mxu1 }
 0xe47   :  { %v991_v9 = vpop.f32.mrb[30].mxu1 }
 0xe48   :  { %2799 = vtanh.f32 %v989_v6  ;;  %v2410_v10 = vpop.f32.mrb[31].mxu1  ;;  %v3696_v6 = vld [vmem:[%s3952_s2] ss:$0 sm:$0xff] }
 0xe52   :  { %v2800_v11 = vpop.eup %2799 }
 0xe53   :  { %v3468_v12 = vadd.f32 %v2800_v11, %v3381_v28 }
 0xe55   :  { %997 = vst [vmem:[#allocation3 + $0x18] sm:$0xff] %v3468_v12  ;;  %v998_v14 = vpack.c.bf16 %v3468_v12, %v3468_v12 }
 0xe57   :  { %2428 = vmatmul.mubr.bf16.vlgmr.msra.gmra.mrb[32].mxu0 %v998_v14 }
 0xe58   :  { %2452 = vmatpush3.bf16.msra.mxu0 %v3041_v18  ;;  %2467 = vmatprep.mubr.msk.bf16.mxu0 %vm2893_vm0, %v2892_v1 }
 0xe59   :  { %2453 = vmatprep.subr.bf16.mxu0 %v2892_v1 }
 0xe5c   :  { %2454 = vmatpush3.bf16.msra.mxu0 %v3047_v19 }
 0xe5d   :  { %2455 = vmatprep.subr.bf16.mxu0 %v2892_v1 }
 0xe60   :  { %2456 = vmatpush3.bf16.msra.mxu0 %v3054_v20 }
 0xe61   :  { %2457 = vmatprep.subr.bf16.mxu0 %v2892_v1 }
 0xe64   :  { %2458 = vmatpush3.bf16.msra.mxu0 %v3061_v21 }
 0xe65   :  { %2459 = vmatprep.subr.bf16.mxu0 %v2892_v1 }
 0xe68   :  { %2460 = vmatpush3.bf16.msra.mxu0 %v3077_v30 }
 0xe69   :  { %2461 = vmatprep.subr.bf16.mxu0 %v2892_v1 }
 0xe6c   :  { %2462 = vmatpush3.bf16.msra.mxu0 %v3084_v31 }
 0xe6d   :  { %2463 = vmatprep.subr.bf16.mxu0 %v2892_v1 }
 0xe70   :  { %2464 = vmatpush3.bf16.msra.mxu0 %v3091_v32 }
 0xe71   :  { %2465 = vmatprep.subr.bf16.mxu0 %v2892_v1 }
 0xe74   :  { %2466 = vmatpush3.bf16.msra.mxu0 %v3098_v33 }
 0xe75   :  { %2491 = vmatprep.subr.bf16.mxu0 %v2892_v1 }
 0xf2a   :  { %v1033_v15 = vpop.f32.mrb[32].mxu0 }
 0xf2b   :  { %v1034_v16 = vadd.f32 %v3069_v22, %v1033_v15  ;;  %v2429_v17 = vpop.f32.mrb[33].mxu0  ;;  %v3513_v22 = vld [vmem:[%s3950_s0 + $0x10] sm:$0xff]   ;;  %v3702_v15 = vld [vmem:[%s3951_s1 + $0xc0] sm:$0xff]  }
 0xf2c   :  { %v1036_v18 = vpop.f32.mrb[34].mxu0  ;;  %v1043_v30 = vunpack.c.l.bf16 %v3513_v22  ;;  %v3718_v17 = vld [vmem:[%s3951_s1 + $0xd0] sm:$0xff]  }
 0xf2d   :  { %2801 = vtanh.f32 %v1034_v16  ;;  %v2430_v19 = vpop.f32.mrb[35].mxu0  ;;  %v3711_v16 = vld [vmem:[%s3951_s1 + $0xc8] sm:$0xff]   ;;  %v3725_v18 = vld [vmem:[%s3951_s1 + $0xd8] sm:$0xff]  }
 0xf2e   :  { %v3732_v19 = vld [vmem:[%s3951_s1 + $0xe0] sm:$0xff]  }
 0xf37   :  { %v2802_v20 = vpop.eup %2801 }
 0xf38   :  { %v1040_v21 = vpack.c.bf16 %v2802_v20, %v2802_v20  ;;  %v3739_v20 = vld [vmem:[%s3951_s1 + $0xe8] sm:$0xff]  }
 0xf3a   :  { %2448 = vmatmul.mubr.bf16.vlgmr.msra.gmra.mrb[32].mxu1 %v1040_v21  ;;  %v3746_v21 = vld [vmem:[%s3951_s1 + $0xf0] sm:$0xff]  }
 0xf3b   :  { %2472 = vmatpush3.bf16.msra.mxu1 %v3105_v34  ;;  %2487 = vmatprep.mubr.msk.bf16.mxu1 %vm2893_vm0, %v2892_v1 }
 0xf3c   :  { %2473 = vmatprep.subr.bf16.mxu1 %v2892_v1 }
 0xf3f   :  { %2474 = vmatpush3.bf16.msra.mxu1 %v3111_v35 }
 0xf40   :  { %2475 = vmatprep.subr.bf16.mxu1 %v2892_v1 }
 0xf43   :  { %2476 = vmatpush3.bf16.msra.mxu1 %v3118_v36 }
 0xf44   :  { %2477 = vmatprep.subr.bf16.mxu1 %v2892_v1 }
 0xf47   :  { %2478 = vmatpush3.bf16.msra.mxu1 %v3125_v37 }
 0xf48   :  { %2479 = vmatprep.subr.bf16.mxu1 %v2892_v1 }
 0xf4b   :  { %2480 = vmatpush3.bf16.msra.mxu1 %v3157_v47  ;;  %v3523_v47 = vld [vmem:[%s3951_s1 + $0x8] sm:$0xff]  }
 0xf4c   :  { %2481 = vmatprep.subr.bf16.mxu1 %v2892_v1 }
 0xf4f   :  { %2482 = vmatpush3.bf16.msra.mxu1 %v3164_v48  ;;  %v3530_v48 = vld [vmem:[%s3951_s1 + $0x10] sm:$0xff]  }
 0xf50   :  { %2483 = vmatprep.subr.bf16.mxu1 %v2892_v1 }
 0xf53   :  { %2484 = vmatpush3.bf16.msra.mxu1 %v3171_v49  ;;  %v3537_v49 = vld [vmem:[%s3951_s1 + $0x18] sm:$0xff]  }
 0xf54   :  { %2485 = vmatprep.subr.bf16.mxu1 %v2892_v1 }
 0xf57   :  { %2486 = vmatpush3.bf16.msra.mxu1 %v3178_v50  ;;  %v3544_v50 = vld [vmem:[%s3951_s1 + $0x20] sm:$0xff]  }
 0xf58   :  { %2511 = vmatprep.subr.bf16.mxu1 %v2892_v1 }
0x100d   :  { %v1078_v31 = vpop.f32.mrb[32].mxu1 }
0x100e   :  { %v1079_v32 = vadd.f32 %v1078_v31, %v1043_v30  ;;  %v2449_v33 = vpop.f32.mrb[33].mxu1  ;;  %v3753_v30 = vld [vmem:[%s3951_s1 + $0xf8] sm:$0xff]   ;;  %v1217_v31 = vunpack.c.h.bf16 %v3513_v22 }
0x100f   :  { %v1081_v34 = vpop.f32.mrb[34].mxu1 }
0x1010   :  { %2803 = vtanh.f32 %v1079_v32  ;;  %v2450_v35 = vpop.f32.mrb[35].mxu1 }
0x101a   :  { %v2804_v36 = vpop.eup %2803 }
0x101b   :  { %v1085_v37 = vpack.c.bf16 %v2804_v36, %v2804_v36 }
0x101d   :  { %2468 = vmatmul.mubr.bf16.vlgmr.msra.gmra.mrb[36].mxu0 %v1085_v37 }
0x101e   :  { %2492 = vmatpush3.bf16.msra.mxu0 %v3427_v57  ;;  %2507 = vmatprep.mubr.msk.bf16.mxu0 %vm2893_vm0, %v2892_v1 }
0x101f   :  { %2493 = vmatprep.subr.bf16.mxu0 %v2892_v1 }
0x1022   :  { %2494 = vmatpush3.bf16.msra.mxu0 %v3523_v47 }
0x1023   :  { %2495 = vmatprep.subr.bf16.mxu0 %v2892_v1 }
0x1026   :  { %2496 = vmatpush3.bf16.msra.mxu0 %v3530_v48 }
0x1027   :  { %2497 = vmatprep.subr.bf16.mxu0 %v2892_v1 }
0x102a   :  { %2498 = vmatpush3.bf16.msra.mxu0 %v3537_v49 }
0x102b   :  { %2499 = vmatprep.subr.bf16.mxu0 %v2892_v1 }
0x102e   :  { %2500 = vmatpush3.bf16.msra.mxu0 %v3544_v50 }
0x102f   :  { %2501 = vmatprep.subr.bf16.mxu0 %v2892_v1 }
0x1032   :  { %2502 = vmatpush3.bf16.msra.mxu0 %v3551_v61 }
0x1033   :  { %2503 = vmatprep.subr.bf16.mxu0 %v2892_v1 }
0x1036   :  { %2504 = vmatpush3.bf16.msra.mxu0 %v3558_v62 }
0x1037   :  { %2505 = vmatprep.subr.bf16.mxu0 %v2892_v1 }
0x103a   :  { %2506 = vmatpush3.bf16.msra.mxu0 %v3565_v63 }
0x103b   :  { %2531 = vmatprep.subr.bf16.mxu0 %v2892_v1 }
0x10f0   :  { %v1120_v13 = vpop.f32.mrb[36].mxu0 }
0x10f1   :  { %v1121_v24 = vadd.f32 %v3185_v51, %v1120_v13  ;;  %v2469_v25 = vpop.f32.mrb[37].mxu0  ;;  %v3582_v51 = vld [vmem:[%s3951_s1 + $0x48] sm:$0xff]  }
0x10f2   :  { %v1123_v27 = vpop.f32.mrb[38].mxu0 }
0x10f3   :  { %2805 = vtanh.f32 %v1121_v24  ;;  %v2470_v23 = vpop.f32.mrb[39].mxu0  ;;  %v3779_v24 = vld [vmem:[%s3952_s2 + $0x1] ss:$0 sm:$0xff] }
0x10fd   :  { %v2806_v28 = vpop.eup %2805 }
0x10fe   :  { %v1127_v29 = vpack.c.bf16 %v2806_v28, %v2806_v28 }
0x1100   :  { %2488 = vmatmul.mubr.bf16.vlgmr.msra.gmra.mrb[36].mxu1 %v1127_v29 }
0x1101   :  { %2512 = vmatpush3.bf16.msra.mxu1 %v3573_v26  ;;  %2527 = vmatprep.mubr.msk.bf16.mxu1 %vm2893_vm0, %v2892_v1 }
0x1102   :  { %2513 = vmatprep.subr.bf16.mxu1 %v2892_v1 }
0x1105   :  { %2514 = vmatpush3.bf16.msra.mxu1 %v3582_v51 }
0x1106   :  { %2515 = vmatprep.subr.bf16.mxu1 %v2892_v1 }
0x1109   :  { %2516 = vmatpush3.bf16.msra.mxu1 %v3589_v39 }
0x110a   :  { %2517 = vmatprep.subr.bf16.mxu1 %v2892_v1 }
0x110d   :  { %2518 = vmatpush3.bf16.msra.mxu1 %v3596_v40 }
0x110e   :  { %2519 = vmatprep.subr.bf16.mxu1 %v2892_v1 }
0x1111   :  { %2520 = vmatpush3.bf16.msra.mxu1 %v3603_v41 }
0x1112   :  { %2521 = vmatprep.subr.bf16.mxu1 %v2892_v1 }
0x1115   :  { %2522 = vmatpush3.bf16.msra.mxu1 %v3610_v42 }
0x1116   :  { %2523 = vmatprep.subr.bf16.mxu1 %v2892_v1 }
0x1119   :  { %2524 = vmatpush3.bf16.msra.mxu1 %v3617_v44 }
0x111a   :  { %2525 = vmatprep.subr.bf16.mxu1 %v2892_v1 }
0x111d   :  { %2526 = vmatpush3.bf16.msra.mxu1 %v3624_v45 }
0x111e   :  { %2551 = vmatprep.subr.bf16.mxu1 %v2892_v1 }
0x11d3   :  { %v1162_v46 = vpop.f32.mrb[36].mxu1 }
0x11d4   :  { %v1163_v52 = vadd.f32 %v3209_v59, %v1162_v46  ;;  %v2489_v53 = vpop.f32.mrb[37].mxu1  ;;  %v3647_v59 = vld [vmem:[%s3951_s1 + $0x88] sm:$0xff]  }
0x11d5   :  { %v1165_v38 = vpop.f32.mrb[38].mxu1  ;;  %v3803_v53 = vld [vmem:[%s3952_s2 + $0x2] ss:$0 sm:$0xff] }
0x11d6   :  { %2807 = vtanh.f32 %v1163_v52  ;;  %v2490_v54 = vpop.f32.mrb[39].mxu1 }
0x11e0   :  { %v2808_v55 = vpop.eup %2807 }
0x11e1   :  { %v3630_v0 = vadd.f32 %v2808_v55, %v3468_v12 }
0x11e3   :  { %1171 = vst [vmem:[#allocation3 + $0x20] sm:$0xff] %v3630_v0  ;;  %v1172_v56 = vpack.c.bf16 %v3630_v0, %v3630_v0 }
0x11e5   :  { %2508 = vmatmul.mubr.bf16.vlgmr.msra.gmra.mrb[40].mxu0 %v1172_v56 }
0x11e6   :  { %2532 = vmatpush3.bf16.msra.mxu0 %v3638_v2  ;;  %2547 = vmatprep.mubr.msk.bf16.mxu0 %vm2893_vm0, %v2892_v1 }
0x11e7   :  { %2533 = vmatprep.subr.bf16.mxu0 %v2892_v1 }
0x11ea   :  { %2534 = vmatpush3.bf16.msra.mxu0 %v3647_v59 }
0x11eb   :  { %2535 = vmatprep.subr.bf16.mxu0 %v2892_v1 }
0x11ee   :  { %2536 = vmatpush3.bf16.msra.mxu0 %v3654_v3 }
0x11ef   :  { %2537 = vmatprep.subr.bf16.mxu0 %v2892_v1 }
0x11f2   :  { %2538 = vmatpush3.bf16.msra.mxu0 %v3661_v5 }
0x11f3   :  { %2539 = vmatprep.subr.bf16.mxu0 %v2892_v1 }
0x11f6   :  { %2540 = vmatpush3.bf16.msra.mxu0 %v3668_v43 }
0x11f7   :  { %2541 = vmatprep.subr.bf16.mxu0 %v2892_v1 }
0x11fa   :  { %2542 = vmatpush3.bf16.msra.mxu0 %v3675_v7 }
0x11fb   :  { %2543 = vmatprep.subr.bf16.mxu0 %v2892_v1 }
0x11fe   :  { %2544 = vmatpush3.bf16.msra.mxu0 %v3682_v58 }
0x11ff   :  { %2545 = vmatprep.subr.bf16.mxu0 %v2892_v1 }
0x1202   :  { %2546 = vmatpush3.bf16.msra.mxu0 %v3689_v60 }
0x1203   :  { %2571 = vmatprep.subr.bf16.mxu0 %v2892_v1 }
0x12b8   :  { %v1207_v4 = vpop.f32.mrb[40].mxu0 }
0x12b9   :  { %v1208_v8 = vadd.f32 %v3696_v6, %v1207_v4  ;;  %v2509_v9 = vpop.f32.mrb[41].mxu0 }
0x12ba   :  { %v1210_v10 = vpop.f32.mrb[42].mxu0 }
0x12bb   :  { %2809 = vtanh.f32 %v1208_v8  ;;  %v2510_v11 = vpop.f32.mrb[43].mxu0 }
0x12c5   :  { %v2810_v12 = vpop.eup %2809 }
0x12c6   :  { %v1214_v14 = vpack.c.bf16 %v2810_v12, %v2810_v12 }
0x12c8   :  { %2528 = vmatmul.mubr.bf16.vlgmr.msra.gmra.mrb[40].mxu1 %v1214_v14 }
0x12c9   :  { %2552 = vmatpush3.bf16.msra.mxu1 %v3702_v15  ;;  %2567 = vmatprep.mubr.msk.bf16.mxu1 %vm2893_vm0, %v2892_v1 }
0x12ca   :  { %2553 = vmatprep.subr.bf16.mxu1 %v2892_v1 }
0x12cd   :  { %2554 = vmatpush3.bf16.msra.mxu1 %v3711_v16 }
0x12ce   :  { %2555 = vmatprep.subr.bf16.mxu1 %v2892_v1 }
0x12d1   :  { %2556 = vmatpush3.bf16.msra.mxu1 %v3718_v17 }
0x12d2   :  { %2557 = vmatprep.subr.bf16.mxu1 %v2892_v1 }
0x12d5   :  { %2558 = vmatpush3.bf16.msra.mxu1 %v3725_v18 }
0x12d6   :  { %2559 = vmatprep.subr.bf16.mxu1 %v2892_v1 }
0x12d9   :  { %2560 = vmatpush3.bf16.msra.mxu1 %v3732_v19 }
0x12da   :  { %2561 = vmatprep.subr.bf16.mxu1 %v2892_v1 }
0x12dd   :  { %2562 = vmatpush3.bf16.msra.mxu1 %v3739_v20 }
0x12de   :  { %2563 = vmatprep.subr.bf16.mxu1 %v2892_v1 }
0x12e1   :  { %2564 = vmatpush3.bf16.msra.mxu1 %v3746_v21 }
0x12e2   :  { %2565 = vmatprep.subr.bf16.mxu1 %v2892_v1 }
0x12e5   :  { %2566 = vmatpush3.bf16.msra.mxu1 %v3753_v30 }
0x12e6   :  { %2591 = vmatprep.subr.bf16.mxu1 %v2892_v1 }
0x139b   :  { %v1252_v32 = vpop.f32.mrb[40].mxu1 }
0x139c   :  { %v1253_v33 = vadd.f32 %v1252_v32, %v1217_v31  ;;  %v2529_v34 = vpop.f32.mrb[41].mxu1 }
0x139d   :  { %v1255_v35 = vpop.f32.mrb[42].mxu1 }
0x139e   :  { %2811 = vtanh.f32 %v1253_v33  ;;  %v2530_v36 = vpop.f32.mrb[43].mxu1  ;;  %v3852_v33 = vld [vmem:[%s3950_s0 + $0x18] sm:$0xff]   ;;  %s2895_s0 = smov [#allocation3]  }
0x139f   :  { %v1391_v34 = vunpack.c.l.bf16 %v3852_v33  ;;  %s1700_s23 = sshll.u32 %s2895_s0, 4  ;;  %s1701_s23 = int_to_ptr.vmem [resolvable:$true] %s1700_s23 }
0x13a0   :  { %s2868_s24 = scalar_lea.vmem %s1701_s23, 1024  ;;  %p2873_p1 = scmp.lt.s32.totalorder %s1701_s23, %s1701_s23 }
0x13a1   :  { %p2869_p0 = scmp.ne.s32.totalorder %s1701_s23, %s2868_s24  ;;  %p2874_p2 = scmp.lt.s32.totalorder %s2868_s24, %s2868_s24 }
0x13a3   :  { %p2875_p3 = por %p2874_p2, %p2873_p1 }
0x13a5   :  { %p2876_p4 = pnand %p2875_p3, %p2869_p0 }
0x13a8   :  { %v2812_v37 = vpop.eup %2811 }
0x13a9   :  { %v1259_v13 = vpack.c.bf16 %v2812_v37, %v2812_v37 }
0x13ab   :  { %2548 = vmatmul.mubr.bf16.vlgmr.msra.gmra.mrb[44].mxu0 %v1259_v13 }
0x13ac   :  { %2572 = vmatpush3.bf16.msra.mxu0 %v3427_v57  ;;  %2587 = vmatprep.mubr.msk.bf16.mxu0 %vm2893_vm0, %v2892_v1 }
0x13ad   :  { %2573 = vmatprep.subr.bf16.mxu0 %v2892_v1 }
0x13b0   :  { %2574 = vmatpush3.bf16.msra.mxu0 %v3523_v47 }
0x13b1   :  { %2575 = vmatprep.subr.bf16.mxu0 %v2892_v1 }
0x13b4   :  { %2576 = vmatpush3.bf16.msra.mxu0 %v3530_v48 }
0x13b5   :  { %2577 = vmatprep.subr.bf16.mxu0 %v2892_v1 }
0x13b8   :  { %2578 = vmatpush3.bf16.msra.mxu0 %v3537_v49 }
0x13b9   :  { %2579 = vmatprep.subr.bf16.mxu0 %v2892_v1 }
0x13bc   :  { %2580 = vmatpush3.bf16.msra.mxu0 %v3544_v50 }
0x13bd   :  { %2581 = vmatprep.subr.bf16.mxu0 %v2892_v1 }
0x13c0   :  { %2582 = vmatpush3.bf16.msra.mxu0 %v3551_v61 }
0x13c1   :  { %2583 = vmatprep.subr.bf16.mxu0 %v2892_v1 }
0x13c4   :  { %2584 = vmatpush3.bf16.msra.mxu0 %v3558_v62 }
0x13c5   :  { %2585 = vmatprep.subr.bf16.mxu0 %v2892_v1 }
0x13c8   :  { %2586 = vmatpush3.bf16.msra.mxu0 %v3565_v63 }
0x13c9   :  { %2611 = vmatprep.subr.bf16.mxu0 %v2892_v1 }
0x147e   :  { %v1294_v22 = vpop.f32.mrb[44].mxu0 }
0x147f   :  { %v1295_v25 = vadd.f32 %v3779_v24, %v1294_v22  ;;  %v2549_v27 = vpop.f32.mrb[45].mxu0 }
0x1480   :  { %v1297_v23 = vpop.f32.mrb[46].mxu0 }
0x1481   :  { %2813 = vtanh.f32 %v1295_v25  ;;  %v2550_v28 = vpop.f32.mrb[47].mxu0 }
0x148b   :  { %v2814_v29 = vpop.eup %2813 }
0x148c   :  { %v1301_v46 = vpack.c.bf16 %v2814_v29, %v2814_v29 }
0x148e   :  { %2568 = vmatmul.mubr.bf16.vlgmr.msra.gmra.mrb[44].mxu1 %v1301_v46 }
0x148f   :  { %2592 = vmatpush3.bf16.msra.mxu1 %v3573_v26  ;;  %2607 = vmatprep.mubr.msk.bf16.mxu1 %vm2893_vm0, %v2892_v1 }
0x1490   :  { %2593 = vmatprep.subr.bf16.mxu1 %v2892_v1 }
0x1493   :  { %2594 = vmatpush3.bf16.msra.mxu1 %v3582_v51 }
0x1494   :  { %2595 = vmatprep.subr.bf16.mxu1 %v2892_v1 }
0x1497   :  { %2596 = vmatpush3.bf16.msra.mxu1 %v3589_v39 }
0x1498   :  { %2597 = vmatprep.subr.bf16.mxu1 %v2892_v1 }
0x149b   :  { %2598 = vmatpush3.bf16.msra.mxu1 %v3596_v40 }
0x149c   :  { %2599 = vmatprep.subr.bf16.mxu1 %v2892_v1 }
0x149f   :  { %2600 = vmatpush3.bf16.msra.mxu1 %v3603_v41 }
0x14a0   :  { %2601 = vmatprep.subr.bf16.mxu1 %v2892_v1 }
0x14a3   :  { %2602 = vmatpush3.bf16.msra.mxu1 %v3610_v42 }
0x14a4   :  { %2603 = vmatprep.subr.bf16.mxu1 %v2892_v1 }
0x14a7   :  { %2604 = vmatpush3.bf16.msra.mxu1 %v3617_v44 }
0x14a8   :  { %2605 = vmatprep.subr.bf16.mxu1 %v2892_v1 }
0x14ab   :  { %2606 = vmatpush3.bf16.msra.mxu1 %v3624_v45 }
0x14ac   :  { %2631 = vmatprep.subr.bf16.mxu1 %v2892_v1 }
0x1561   :  { %v1336_v52 = vpop.f32.mrb[44].mxu1 }
0x1562   :  { %v1337_v38 = vadd.f32 %v3803_v53, %v1336_v52  ;;  %v2569_v54 = vpop.f32.mrb[45].mxu1 }
0x1563   :  { %v1339_v55 = vpop.f32.mrb[46].mxu1 }
0x1564   :  { %2815 = vtanh.f32 %v1337_v38  ;;  %v2570_v56 = vpop.f32.mrb[47].mxu1 }
0x156e   :  { %v2816_v4 = vpop.eup %2815 }
0x156f   :  { %v3807_v8 = vadd.f32 %v2816_v4, %v3630_v0 }
0x1571   :  { %1345 = vst [vmem:[#allocation3 + $0x28] sm:$0xff] %v3807_v8  ;;  %v1346_v9 = vpack.c.bf16 %v3807_v8, %v3807_v8 }
0x1573   :  { %2588 = vmatmul.mubr.bf16.vlgmr.msra.gmra.mrb[48].mxu0 %v1346_v9 }
0x1574   :  { %2612 = vmatpush3.bf16.msra.mxu0 %v3638_v2  ;;  %2627 = vmatprep.mubr.msk.bf16.mxu0 %vm2893_vm0, %v2892_v1 }
0x1575   :  { %2613 = vmatprep.subr.bf16.mxu0 %v2892_v1 }
0x1578   :  { %2614 = vmatpush3.bf16.msra.mxu0 %v3647_v59 }
0x1579   :  { %2615 = vmatprep.subr.bf16.mxu0 %v2892_v1 }
0x157c   :  { %2616 = vmatpush3.bf16.msra.mxu0 %v3654_v3 }
0x157d   :  { %2617 = vmatprep.subr.bf16.mxu0 %v2892_v1 }
0x1580   :  { %2618 = vmatpush3.bf16.msra.mxu0 %v3661_v5 }
0x1581   :  { %2619 = vmatprep.subr.bf16.mxu0 %v2892_v1 }
0x1584   :  { %2620 = vmatpush3.bf16.msra.mxu0 %v3668_v43 }
0x1585   :  { %2621 = vmatprep.subr.bf16.mxu0 %v2892_v1 }
0x1588   :  { %2622 = vmatpush3.bf16.msra.mxu0 %v3675_v7 }
0x1589   :  { %2623 = vmatprep.subr.bf16.mxu0 %v2892_v1 }
0x158c   :  { %2624 = vmatpush3.bf16.msra.mxu0 %v3682_v58 }
0x158d   :  { %2625 = vmatprep.subr.bf16.mxu0 %v2892_v1 }
0x1590   :  { %2626 = vmatpush3.bf16.msra.mxu0 %v3689_v60 }
0x1591   :  { %2651 = vmatprep.subr.bf16.mxu0 %v2892_v1 }
0x1646   :  { %v1381_v0 = vpop.f32.mrb[48].mxu0 }
0x1647   :  { %v1382_v10 = vadd.f32 %v3696_v6, %v1381_v0  ;;  %v2589_v11 = vpop.f32.mrb[49].mxu0 }
0x1648   :  { %v1384_v12 = vpop.f32.mrb[50].mxu0 }
0x1649   :  { %2817 = vtanh.f32 %v1382_v10  ;;  %v2590_v14 = vpop.f32.mrb[51].mxu0 }
0x1653   :  { %v2818_v31 = vpop.eup %2817 }
0x1654   :  { %v1388_v32 = vpack.c.bf16 %v2818_v31, %v2818_v31 }
0x1656   :  { %2608 = vmatmul.mubr.bf16.vlgmr.msra.gmra.mrb[48].mxu1 %v1388_v32 }
0x1657   :  { %2632 = vmatpush3.bf16.msra.mxu1 %v3702_v15  ;;  %2647 = vmatprep.mubr.msk.bf16.mxu1 %vm2893_vm0, %v2892_v1 }
0x1658   :  { %2633 = vmatprep.subr.bf16.mxu1 %v2892_v1 }
0x165b   :  { %2634 = vmatpush3.bf16.msra.mxu1 %v3711_v16 }
0x165c   :  { %2635 = vmatprep.subr.bf16.mxu1 %v2892_v1 }
0x165f   :  { %2636 = vmatpush3.bf16.msra.mxu1 %v3718_v17 }
0x1660   :  { %2637 = vmatprep.subr.bf16.mxu1 %v2892_v1 }
0x1663   :  { %2638 = vmatpush3.bf16.msra.mxu1 %v3725_v18 }
0x1664   :  { %2639 = vmatprep.subr.bf16.mxu1 %v2892_v1 }
0x1667   :  { %2640 = vmatpush3.bf16.msra.mxu1 %v3732_v19 }
0x1668   :  { %2641 = vmatprep.subr.bf16.mxu1 %v2892_v1 }
0x166b   :  { %2642 = vmatpush3.bf16.msra.mxu1 %v3739_v20 }
0x166c   :  { %2643 = vmatprep.subr.bf16.mxu1 %v2892_v1 }
0x166f   :  { %2644 = vmatpush3.bf16.msra.mxu1 %v3746_v21 }
0x1670   :  { %2645 = vmatprep.subr.bf16.mxu1 %v2892_v1 }
0x1673   :  { %2646 = vmatpush3.bf16.msra.mxu1 %v3753_v30 }
0x1674   :  { %2671 = vmatprep.subr.bf16.mxu1 %v2892_v1 }
0x1729   :  { %v1426_v35 = vpop.f32.mrb[48].mxu1 }
0x172a   :  { %v1427_v36 = vadd.f32 %v1426_v35, %v1391_v34  ;;  %v2609_v37 = vpop.f32.mrb[49].mxu1 }
0x172b   :  { %v1429_v13 = vpop.f32.mrb[50].mxu1 }
0x172c   :  { %2819 = vtanh.f32 %v1427_v36  ;;  %v2610_v22 = vpop.f32.mrb[51].mxu1 }
0x1736   :  { %v2820_v25 = vpop.eup %2819 }
0x1737   :  { %v1433_v27 = vpack.c.bf16 %v2820_v25, %v2820_v25 }
0x1739   :  { %2628 = vmatmul.mubr.bf16.vlgmr.msra.gmra.mrb[52].mxu0 %v1433_v27 }
0x173a   :  { %2652 = vmatpush3.bf16.msra.mxu0 %v3427_v57  ;;  %2667 = vmatprep.mubr.msk.bf16.mxu0 %vm2893_vm0, %v2892_v1 }
0x173b   :  { %2653 = vmatprep.subr.bf16.mxu0 %v2892_v1 }
0x173e   :  { %2654 = vmatpush3.bf16.msra.mxu0 %v3523_v47 }
0x173f   :  { %2655 = vmatprep.subr.bf16.mxu0 %v2892_v1 }
0x1742   :  { %2656 = vmatpush3.bf16.msra.mxu0 %v3530_v48 }
0x1743   :  { %2657 = vmatprep.subr.bf16.mxu0 %v2892_v1 }
0x1746   :  { %2658 = vmatpush3.bf16.msra.mxu0 %v3537_v49 }
0x1747   :  { %2659 = vmatprep.subr.bf16.mxu0 %v2892_v1 }
0x174a   :  { %2660 = vmatpush3.bf16.msra.mxu0 %v3544_v50 }
0x174b   :  { %2661 = vmatprep.subr.bf16.mxu0 %v2892_v1 }
0x174e   :  { %2662 = vmatpush3.bf16.msra.mxu0 %v3551_v61 }
0x174f   :  { %2663 = vmatprep.subr.bf16.mxu0 %v2892_v1 }
0x1752   :  { %2664 = vmatpush3.bf16.msra.mxu0 %v3558_v62 }
0x1753   :  { %2665 = vmatprep.subr.bf16.mxu0 %v2892_v1 }
0x1756   :  { %2666 = vmatpush3.bf16.msra.mxu0 %v3565_v63 }
0x1757   :  { %2691 = vmatprep.subr.bf16.mxu0 %v2892_v1 }
0x180c   :  { %v1468_v57 = vpop.f32.mrb[52].mxu0 }
0x180d   :  { %v1469_v47 = vadd.f32 %v3779_v24, %v1468_v57  ;;  %v2629_v48 = vpop.f32.mrb[53].mxu0 }
0x180e   :  { %v1471_v49 = vpop.f32.mrb[54].mxu0 }
0x180f   :  { %2821 = vtanh.f32 %v1469_v47  ;;  %v2630_v50 = vpop.f32.mrb[55].mxu0 }
0x1819   :  { %v2822_v23 = vpop.eup %2821 }
0x181a   :  { %v1475_v28 = vpack.c.bf16 %v2822_v23, %v2822_v23 }
0x181c   :  { %2648 = vmatmul.mubr.bf16.vlgmr.msra.gmra.mrb[52].mxu1 %v1475_v28 }
0x181d   :  { %2672 = vmatpush3.bf16.msra.mxu1 %v3573_v26  ;;  %2687 = vmatprep.mubr.msk.bf16.mxu1 %vm2893_vm0, %v2892_v1 }
0x181e   :  { %2673 = vmatprep.subr.bf16.mxu1 %v2892_v1 }
0x1821   :  { %2674 = vmatpush3.bf16.msra.mxu1 %v3582_v51 }
0x1822   :  { %2675 = vmatprep.subr.bf16.mxu1 %v2892_v1 }
0x1825   :  { %2676 = vmatpush3.bf16.msra.mxu1 %v3589_v39 }
0x1826   :  { %2677 = vmatprep.subr.bf16.mxu1 %v2892_v1 }
0x1829   :  { %2678 = vmatpush3.bf16.msra.mxu1 %v3596_v40 }
0x182a   :  { %2679 = vmatprep.subr.bf16.mxu1 %v2892_v1 }
0x182d   :  { %2680 = vmatpush3.bf16.msra.mxu1 %v3603_v41 }
0x182e   :  { %2681 = vmatprep.subr.bf16.mxu1 %v2892_v1 }
0x1831   :  { %2682 = vmatpush3.bf16.msra.mxu1 %v3610_v42 }
0x1832   :  { %2683 = vmatprep.subr.bf16.mxu1 %v2892_v1 }
0x1835   :  { %2684 = vmatpush3.bf16.msra.mxu1 %v3617_v44 }
0x1836   :  { %2685 = vmatprep.subr.bf16.mxu1 %v2892_v1 }
0x1839   :  { %2686 = vmatpush3.bf16.msra.mxu1 %v3624_v45 }
0x183a   :  { %2711 = vmatprep.subr.bf16.mxu1 %v2892_v1 }
0x18ef   :  { %v1510_v61 = vpop.f32.mrb[52].mxu1 }
0x18f0   :  { %v1511_v62 = vadd.f32 %v3803_v53, %v1510_v61  ;;  %v2649_v63 = vpop.f32.mrb[53].mxu1 }
0x18f1   :  { %v1513_v26 = vpop.f32.mrb[54].mxu1 }
0x18f2   :  { %2823 = vtanh.f32 %v1511_v62  ;;  %v2650_v51 = vpop.f32.mrb[55].mxu1 }
0x18fc   :  { %v2824_v39 = vpop.eup %2823 }
0x18fd   :  { %v3894_v40 = vadd.f32 %v2824_v39, %v3807_v8 }
0x18ff   :  { %1519 = vst [vmem:[#allocation3 + $0x30] sm:$0xff] %v3894_v40  ;;  %v1520_v41 = vpack.c.bf16 %v3894_v40, %v3894_v40 }
0x1901   :  { %2668 = vmatmul.mubr.bf16.vlgmr.msra.gmra.mrb[56].mxu0 %v1520_v41 }
0x1902   :  { %2692 = vmatpush3.bf16.msra.mxu0 %v3638_v2  ;;  %2707 = vmatprep.mubr.msk.bf16.mxu0 %vm2893_vm0, %v2892_v1 }
0x1903   :  { %2693 = vmatprep.subr.bf16.mxu0 %v2892_v1 }
0x1906   :  { %2694 = vmatpush3.bf16.msra.mxu0 %v3647_v59 }
0x1907   :  { %2695 = vmatprep.subr.bf16.mxu0 %v2892_v1 }
0x190a   :  { %2696 = vmatpush3.bf16.msra.mxu0 %v3654_v3 }
0x190b   :  { %2697 = vmatprep.subr.bf16.mxu0 %v2892_v1 }
0x190e   :  { %2698 = vmatpush3.bf16.msra.mxu0 %v3661_v5 }
0x190f   :  { %2699 = vmatprep.subr.bf16.mxu0 %v2892_v1 }
0x1912   :  { %2700 = vmatpush3.bf16.msra.mxu0 %v3668_v43  ;;  %v1565_v43 = vunpack.c.h.bf16 %v3852_v33 }
0x1913   :  { %2701 = vmatprep.subr.bf16.mxu0 %v2892_v1 }
0x1916   :  { %2702 = vmatpush3.bf16.msra.mxu0 %v3675_v7 }
0x1917   :  { %2703 = vmatprep.subr.bf16.mxu0 %v2892_v1 }
0x191a   :  { %2704 = vmatpush3.bf16.msra.mxu0 %v3682_v58 }
0x191b   :  { %2705 = vmatprep.subr.bf16.mxu0 %v2892_v1 }
0x191e   :  { %2706 = vmatpush3.bf16.msra.mxu0 %v3689_v60 }
0x19d4   :  { %v1555_v42 = vpop.f32.mrb[56].mxu0 }
0x19d5   :  { %v1556_v44 = vadd.f32 %v3696_v6, %v1555_v42  ;;  %v2669_v45 = vpop.f32.mrb[57].mxu0 }
0x19d6   :  { %v1558_v2 = vpop.f32.mrb[58].mxu0 }
0x19d7   :  { %2825 = vtanh.f32 %v1556_v44  ;;  %v2670_v59 = vpop.f32.mrb[59].mxu0 }
0x19e1   :  { %v2826_v3 = vpop.eup %2825 }
0x19e2   :  { %v1562_v5 = vpack.c.bf16 %v2826_v3, %v2826_v3 }
0x19e4   :  { %2688 = vmatmul.mubr.bf16.vlgmr.msra.gmra.mrb[56].mxu1 %v1562_v5 }
0x19e5   :  { %2712 = vmatpush3.bf16.msra.mxu1 %v3702_v15  ;;  %2727 = vmatprep.mubr.msk.bf16.mxu1 %vm2893_vm0, %v2892_v1 }
0x19e6   :  { %2713 = vmatprep.subr.bf16.mxu1 %v2892_v1 }
0x19e9   :  { %2714 = vmatpush3.bf16.msra.mxu1 %v3711_v16 }
0x19ea   :  { %2715 = vmatprep.subr.bf16.mxu1 %v2892_v1 }
0x19ed   :  { %2716 = vmatpush3.bf16.msra.mxu1 %v3718_v17 }
0x19ee   :  { %2717 = vmatprep.subr.bf16.mxu1 %v2892_v1 }
0x19f1   :  { %2718 = vmatpush3.bf16.msra.mxu1 %v3725_v18 }
0x19f2   :  { %2719 = vmatprep.subr.bf16.mxu1 %v2892_v1 }
0x19f5   :  { %2720 = vmatpush3.bf16.msra.mxu1 %v3732_v19 }
0x19f6   :  { %2721 = vmatprep.subr.bf16.mxu1 %v2892_v1 }
0x19f9   :  { %2722 = vmatpush3.bf16.msra.mxu1 %v3739_v20 }
0x19fa   :  { %2723 = vmatprep.subr.bf16.mxu1 %v2892_v1 }
0x19fd   :  { %2724 = vmatpush3.bf16.msra.mxu1 %v3746_v21 }
0x19fe   :  { %2725 = vmatprep.subr.bf16.mxu1 %v2892_v1 }
0x1a01   :  { %2726 = vmatpush3.bf16.msra.mxu1 %v3753_v30 }
0x1ab7   :  { %v1600_v7 = vpop.f32.mrb[56].mxu1 }
0x1ab8   :  { %v1601_v58 = vadd.f32 %v1600_v7, %v1565_v43  ;;  %v2689_v60 = vpop.f32.mrb[57].mxu1 }
0x1ab9   :  { %v1603_v6 = vpop.f32.mrb[58].mxu1 }
0x1aba   :  { %2827 = vtanh.f32 %v1601_v58  ;;  %v2690_v15 = vpop.f32.mrb[59].mxu1 }
0x1ac4   :  { %v2828_v16 = vpop.eup %2827 }
0x1ac5   :  { %v1607_v17 = vpack.c.bf16 %v2828_v16, %v2828_v16 }
0x1ac7   :  { %2708 = vmatmul.mubr.bf16.vlgmr.msra.gmra.mrb[60].mxu0 %v1607_v17 }
0x1b9a   :  { %v1642_v18 = vpop.f32.mrb[60].mxu0 }
0x1b9b   :  { %v1643_v19 = vadd.f32 %v3779_v24, %v1642_v18  ;;  %v2709_v20 = vpop.f32.mrb[61].mxu0 }
0x1b9c   :  { %v1645_v21 = vpop.f32.mrb[62].mxu0 }
0x1b9d   :  { %2829 = vtanh.f32 %v1643_v19  ;;  %v2710_v1 = vpop.f32.mrb[63].mxu0 }
0x1ba7   :  { %v2830_v29 = vpop.eup %2829 }
0x1ba8   :  { %v1649_v30 = vpack.c.bf16 %v2830_v29, %v2830_v29 }
0x1baa   :  { %2728 = vmatmul.mubr.bf16.vlgmr.msra.gmra.mrb[60].mxu1 %v1649_v30 }
0x1c7d   :  { %v1684_v46 = vpop.f32.mrb[60].mxu1 }
0x1c7e   :  { %v1685_v52 = vadd.f32 %v3803_v53, %v1684_v46  ;;  %v2729_v38 = vpop.f32.mrb[61].mxu1 }
0x1c7f   :  { %v1687_v54 = vpop.f32.mrb[62].mxu1 }
0x1c80   :  { %2831 = vtanh.f32 %v1685_v52  ;;  %v2730_v55 = vpop.f32.mrb[63].mxu1 }
0x1c8a   :  { %v2832_v56 = vpop.eup %2831 }
0x1c8b   :  { %v1691_v24 = vadd.f32 %v2832_v56, %v3894_v40 }
0x1c8d   :  { %1693 = vst [vmem:[#allocation3 + $0x38] sm:$0xff] %v1691_v24 }
0x1c8e   :  { %2879 = shalt.err (!%p2876_p4)
}
0x1c8f   :  { %s2880_s27 = scalar_lea.hbm %s3953_s3, 1024 }
0x1c90   :  { %p2881_p5 = scmp.ne.s32.totalorder %s3953_s3, %s2880_s27  ;;  %p2884_p6 = scmp.lt.u32.totalorder %s2880_s27, %s3953_s3 }
0x1c92   :  { %p2886_p7 = pnand %p2884_p6, %p2881_p5 }
0x1c94   :  { %2889 = shalt.err (!%p2886_p7)
}
0x1c95   :  { %s2896_s5 = smov 128   ;;  %s2897_s6 = smov 8  }
0x1c96   :  { %1706 = dma.vmem_to_hbm [thread:$0]  %s1701_s23, 1024, %s3953_s3, [#allocation4], %s2896_s5, %s2896_s5, %s2897_s6  }
0x1c97   :  { %2890 = dma.done.wait [#allocation4], 1024  }
0x1c98   :  { %2891 = vsyncadd [#allocation4], 4294966272 }
0x1c99   :  { %1710 = vsyncpa [#allocation4], 1 }

</bundles_post_ra>
